<compile_context>
chip_gen: v5e
topology: v5e:2x2
jax: 0.10.0
libtpu: 0.0.40
codegen_flags: <defaults>
</compile_context>

<pallas_src>
import jax
import jax.numpy as jnp
from jax import lax
from jax.experimental import pallas as pl
from jax.experimental.pallas import tpu as pltpu


# Contract the last (channel) dims of both operands: (Cmid, Cin) x (P, Cin)
# -> (Cmid, P).  "A @ B.T" form (same pattern as attention q @ k.T), so the
# channels-first result needs no explicit XLU transpose.
_NT_DIMS = (((1,), (1,)), ((), ()))


# -----------------------------------------------------------------------------
# Fused kernel: reduce_conv(3x3)+BN+ReLU  ->  SE gate  ->  depth_prob_conv(1x1)
# -----------------------------------------------------------------------------
def _fused_depthnet_kernel(xt_ref, wT_ref, scale_ref, shift_ref, gate_ref,
                           pwT_ref, pb_ref, ctx_ref, prob_ref):
    # xt_ref    : (1, tH+2, W+2, Cin) bf16  padded NHWC tile (1-row halo)
    # wT_ref    : (9, Cmid, Cin)      bf16  3x3 conv weight, tap-major, (O, I)
    # scale_ref : (Cmid, 1)           f32   folded BatchNorm scale
    # shift_ref : (Cmid, 1)           f32   folded BatchNorm shift
    # gate_ref  : (1, Cmid, 1)        f32   this view's SE sigmoid gate
    # pwT_ref   : (D, Cmid)           bf16  depth_prob 1x1 weight (transposed)
    # pb_ref    : (D, 1)              f32   depth_prob 1x1 bias
    # ctx_ref   : (1, Cmid, tH*W)     bf16  context out (channels-first flat)
    # prob_ref  : (1, D,    tH*W)     f32   depth-prob out (channels-first flat)
    _, tHp, Wp, Cin = xt_ref.shape
    tH, W = tHp - 2, Wp - 2
    Cmid = wT_ref.shape[1]
    P = tH * W

    # reduce_conv(3x3): nine accumulating bf16 MXU matmuls over shifted views
    # sliced directly from the bf16 ref (no f32 im2col materialization), each
    # emitting the channels-first (Cmid, P) layout directly.
    acc = jnp.zeros((Cmid, P), jnp.float32)
    for t in range(9):
        dh, dw = t // 3, t % 3
        tap = xt_ref[0, dh:dh + tH, dw:dw + W, :].reshape(P, Cin)   # bf16
        acc = acc + lax.dot_general(wT_ref[t], tap, _NT_DIMS,
                                    preferred_element_type=jnp.float32)

    # Folded BN + ReLU epilogue in f32; per-channel params are (Cmid, 1)
    # columns so they broadcast along lanes of the channels-first tile.
    ctx = jnp.maximum(acc * scale_ref[...] + shift_ref[...], 0.0)   # (Cmid, P)
    ctx_ref[0] = ctx.astype(ctx_ref.dtype)                          # bf16 store

    # SE modulation (per-view gate) + depth_prob_conv (1x1): a natural
    # (D, Cmid) @ (Cmid, P) MXU matmul -- already channels-first, f32 out.
    gated = (ctx * gate_ref[0]).astype(jnp.bfloat16)                # (Cmid, P)
    prob = jnp.dot(pwT_ref[...], gated,
                   preferred_element_type=jnp.float32) + pb_ref[...]
    prob_ref[0] = prob                                              # (D, P) f32


# -----------------------------------------------------------------------------
# Helpers
# -----------------------------------------------------------------------------
def _vmem_limit_bytes():
    """Per-generation scoped-VMEM limit with headroom for Mosaic scratch."""
    cap = None
    try:
        cap = int(getattr(pltpu.get_tpu_info(), "vmem_capacity_bytes", 0)) or None
    except Exception:
        cap = None
    if cap is None:
        cap = 64 * 1024 * 1024          # conservative (v7x-sized) fallback
    # ~25% headroom for internal scratch + double-buffered BlockSpec DMAs.
    return min((cap * 3) // 4, 96 * 1024 * 1024)


def _choose_h_tile(H, W):
    """Largest H tile giving >=2 pipeline steps with a lane-dense (128-multiple)
    flattened spatial extent; falls back to the full H if none qualifies.
    (Production sizing would additionally cap the tile by the VMEM budget.)"""
    for n_tiles in (2, 4, 8):
        if H % n_tiles == 0:
            tH = H // n_tiles
            if tH >= 4 and (tH * W) % 128 == 0:
                return tH
    return H


# -----------------------------------------------------------------------------
# Forward (matches CameraAwareDepthNet.forward with default flags)
# -----------------------------------------------------------------------------
@jax.jit
def camera_aware_depthnet_forward(params, x_nchw, intrinsics, extrinsics):
    """
    x_nchw:     (B*N_view, C_in, H, W)
    intrinsics: (B, N_view, 3, 3)
    extrinsics: (B, N_view, 4, 4)   (unused, as in the PyTorch forward)
    returns (depth_prob (B*N, D, H, W) f32, context x (B*N, C_mid, H, W) bf16)
    """
    del extrinsics  # unused by the reference module's forward
    B, N_view = intrinsics.shape[:2]
    BN, Cin, H, W = x_nchw.shape
    Cmid = params["conv_w"].shape[-1]
    D = params["prob_w"].shape[-1]

    # --- camera-aware SE gate: (BN, 6) MLP + squeeze/excite.  Far too small
    #     for a Pallas launch -> plain XLA, f32. -----------------------------
    mlp_input = (intrinsics[..., :2, :] / 1000.0).reshape(B * N_view, -1)
    mlp_input = mlp_input.astype(jnp.float32)
    h = jnp.maximum(mlp_input @ params["fc1_w"] + params["fc1_b"], 0.0)
    se = h @ params["fc2_w"] + params["fc2_b"]
    r = jnp.maximum(se @ params["se_red_w"] + params["se_red_b"], 0.0)
    gate = jax.nn.sigmoid(r @ params["se_exp_w"] + params["se_exp_b"])  # (BN,C)
    gate_col = gate[:, :, None]                                   # (BN, Cmid, 1)

    # --- kernel operands.  NCHW->NHWC + pad + bf16 cast fuse into one XLA
    #     pass; weights pre-transposed so the kernel's matmuls emit
    #     channels-first results with no in-kernel transposes. ---------------
    xpad = jnp.pad(jnp.transpose(x_nchw, (0, 2, 3, 1)).astype(jnp.bfloat16),
                   ((0, 0), (1, 1), (1, 1), (0, 0)))              # (BN,H+2,W+2,Cin)
    wT = jnp.transpose(params["conv_w"], (0, 1, 3, 2)) \
            .reshape(9, Cmid, Cin).astype(jnp.bfloat16)           # (9, Cmid, Cin)
    pwT = params["prob_w"].T.astype(jnp.bfloat16)                 # (D, Cmid)
    scale_col = params["bn_scale"].reshape(Cmid, 1)
    shift_col = params["bn_shift"].reshape(Cmid, 1)
    pb_col = params["prob_b"].reshape(D, 1)

    # --- spatial H tiling with 1-row halos (duplicated once at HBM-prep). ---
    tH = _choose_h_tile(H, W)
    nH = H // tH
    xtiles = jnp.stack([xpad[:, h0 * tH:h0 * tH + tH + 2] for h0 in range(nH)],
                       axis=1).reshape(BN * nH, tH + 2, W + 2, Cin)

    cost = pl.CostEstimate(
        flops=2 * BN * H * W * Cmid * (9 * Cin + D),
        transcendentals=0,
        bytes_accessed=(xtiles.size * 2 + wT.size * 2 + pwT.size * 2
                        + (scale_col.size + shift_col.size + gate_col.size
                           + pb_col.size) * 4
                        + BN * Cmid * H * W * 2 + BN * D * H * W * 4),
    )

    ctx_flat, prob_flat = pl.pallas_call(
        _fused_depthnet_kernel,
        out_shape=(
            jax.ShapeDtypeStruct((BN, Cmid, H * W), jnp.bfloat16),
            jax.ShapeDtypeStruct((BN, D, H * W), jnp.float32),
        ),
        grid=(BN, nH),
        in_specs=[
            pl.BlockSpec((1, tH + 2, W + 2, Cin),
                         lambda b, h: (b * nH + h, 0, 0, 0)),
            pl.BlockSpec((9, Cmid, Cin), lambda b, h: (0, 0, 0)),
            pl.BlockSpec((Cmid, 1), lambda b, h: (0, 0)),
            pl.BlockSpec((Cmid, 1), lambda b, h: (0, 0)),
            pl.BlockSpec((1, Cmid, 1), lambda b, h: (b, 0, 0)),
            pl.BlockSpec((D, Cmid), lambda b, h: (0, 0)),
            pl.BlockSpec((D, 1), lambda b, h: (0, 0)),
        ],
        out_specs=(
            pl.BlockSpec((1, Cmid, tH * W), lambda b, h: (b, 0, h)),
            pl.BlockSpec((1, D, tH * W), lambda b, h: (b, 0, h)),
        ),
        compiler_params=pltpu.CompilerParams(
            dimension_semantics=("parallel", "parallel"),
            vmem_limit_bytes=_vmem_limit_bytes(),
        ),
        cost_estimate=cost,
    )(xtiles, wT, scale_col, shift_col, gate_col, pwT, pb_col)

    # Channels-first flat -> NCHW is a pure (free) reshape.
    depth_prob = prob_flat.reshape(BN, D, H, W)
    context = ctx_flat.reshape(BN, Cmid, H, W)
    return depth_prob, context


# -----------------------------------------------------------------------------
# Parameter init (deterministic synthetic; shapes match the nn.Module __init__)
# -----------------------------------------------------------------------------
def init_params(key, in_channels, mid_channels, depth_channels, num_params2=6):
    ks = jax.random.split(key, 12)
    n = lambda k, shape, s: (jax.random.normal(k, shape, jnp.float32) * s)

    p = {}
    # reduce_conv: Conv2d(in, mid, 3, pad=1, bias=False) + BN2d + ReLU
    p["conv_w"] = n(ks[0], (3, 3, in_channels, mid_channels),
                    (2.0 / (9 * in_channels)) ** 0.5)            # HWIO
    gamma = 1.0 + 0.1 * n(ks[1], (mid_channels,), 1.0)
    beta = 0.1 * n(ks[2], (mid_channels,), 1.0)
    rmean = 0.05 * n(ks[3], (mid_channels,), 1.0)
    rvar = jnp.abs(1.0 + 0.1 * n(ks[4], (mid_channels,), 1.0))
    eps = 1e-5
    scale = gamma / jnp.sqrt(rvar + eps)
    p["bn_scale"] = scale.reshape(1, mid_channels)
    p["bn_shift"] = (beta - rmean * scale).reshape(1, mid_channels)

    # depth_mlp: Linear(num_params2, mid) -> ReLU -> Linear(mid, mid)
    p["fc1_w"] = n(ks[5], (num_params2, mid_channels),
                   (1.0 / num_params2) ** 0.5)
    p["fc1_b"] = 0.01 * n(ks[6], (1, mid_channels), 1.0)
    p["fc2_w"] = n(ks[7], (mid_channels, mid_channels),
                   (1.0 / mid_channels) ** 0.5)
    p["fc2_b"] = 0.01 * n(ks[8], (1, mid_channels), 1.0)

    # depth_se: conv_reduce / conv_expand are 1x1 convs with bias on (B,C,1,1)
    p["se_red_w"] = n(ks[9], (mid_channels, mid_channels),
                      (1.0 / mid_channels) ** 0.5)
    p["se_red_b"] = jnp.full((1, mid_channels), 0.01, jnp.float32)
    p["se_exp_w"] = n(ks[10], (mid_channels, mid_channels),
                      (1.0 / mid_channels) ** 0.5)
    p["se_exp_b"] = jnp.full((1, mid_channels), -0.01, jnp.float32)

    # depth_prob_conv: Conv2d(mid, depth_channels, 1, bias=True)
    p["prob_w"] = n(ks[11], (mid_channels, depth_channels),
                    (1.0 / mid_channels) ** 0.5)
    p["prob_b"] = jnp.linspace(-0.05, 0.05, depth_channels,
                               dtype=jnp.float32).reshape(1, depth_channels)
    return p


# -----------------------------------------------------------------------------
# Pure-JAX f32 reference (loose numerical sanity check vs the bf16 kernel)
# -----------------------------------------------------------------------------
def reference_forward(params, x_nchw, intrinsics, extrinsics):
    B, N_view = intrinsics.shape[:2]
    mlp_input = (intrinsics[..., :2, :] / 1000.0).reshape(B * N_view, -1)
    x_nhwc = jnp.transpose(x_nchw, (0, 2, 3, 1)).astype(jnp.float32)

    y = jax.lax.conv_general_dilated(
        x_nhwc, params["conv_w"], (1, 1), "SAME",
        dimension_numbers=("NHWC", "HWIO", "NHWC"))
    y = y * params["bn_scale"][0] + params["bn_shift"][0]
    x_red = jnp.maximum(y, 0.0)

    h = jnp.maximum(mlp_input @ params["fc1_w"] + params["fc1_b"], 0.0)
    se = h @ params["fc2_w"] + params["fc2_b"]
    r = jnp.maximum(se @ params["se_red_w"] + params["se_red_b"], 0.0)
    gate = jax.nn.sigmoid(r @ params["se_exp_w"] + params["se_exp_b"])

    depth = x_red * gate[:, None, None, :]
    depth_prob = depth @ params["prob_w"] + params["prob_b"][0]
    return (jnp.transpose(depth_prob, (0, 3, 1, 2)),
            jnp.transpose(x_red, (0, 3, 1, 2)))


if __name__ == "__main__":
    B, N_view = 1, 2
    in_channels, mid_channels, depth_channels = 16, 32, 16
    H = W = 16
    num_params2 = 6

    key = jax.random.PRNGKey(0)
    k_x, k_i, k_e, k_p = jax.random.split(key, 4)

    x = jax.random.normal(k_x, (B * N_view, in_channels, H, W), jnp.float32)
    intrinsics = 500.0 + 100.0 * jax.random.normal(
        k_i, (B, N_view, 3, 3), jnp.float32)
    extrinsics = jax.random.normal(k_e, (B, N_view, 4, 4), jnp.float32)

    params = init_params(k_p, in_channels, mid_channels, depth_channels,
                         num_params2)

    depth_prob, context = camera_aware_depthnet_forward(
        params, x, intrinsics, extrinsics)
    jax.block_until_ready((depth_prob, context))

    # sanity checks (bf16 MXU inputs / bf16 context vs f32 reference)
    assert depth_prob.shape == (B * N_view, depth_channels, H, W)
    assert context.shape == (B * N_view, mid_channels, H, W)
    assert jnp.all(jnp.isfinite(depth_prob)) and jnp.all(jnp.isfinite(context))
    ref_dp, ref_ctx = reference_forward(params, x, intrinsics, extrinsics)
    assert jnp.allclose(depth_prob, ref_dp, atol=5e-2, rtol=5e-2)
    assert jnp.allclose(context, ref_ctx, atol=5e-2, rtol=5e-2)

    print("KERNEL_OK")
</pallas_src>

<mosaic_0001>
module attributes {stable_mosaic.version = 11 : i64} {
  func.func @_fused_depthnet_kernel(%arg0: i32, %arg1: i32, %arg2: memref<1x10x18x16xbf16, #tpu.memory_space<vmem>>, %arg3: memref<9x32x16xbf16, #tpu.memory_space<vmem>>, %arg4: memref<32x1xf32, #tpu.memory_space<vmem>>, %arg5: memref<32x1xf32, #tpu.memory_space<vmem>>, %arg6: memref<1x32x1xf32, #tpu.memory_space<vmem>>, %arg7: memref<16x32xbf16, #tpu.memory_space<vmem>>, %arg8: memref<16x1xf32, #tpu.memory_space<vmem>>, %arg9: memref<1x32x128xbf16, #tpu.memory_space<vmem>>, %arg10: memref<1x16x128xf32, #tpu.memory_space<vmem>>) attributes {dimension_semantics = [#tpu.dimension_semantics<parallel>, #tpu.dimension_semantics<parallel>], iteration_bounds = array<i64: 2, 2>, scalar_prefetch = 0 : i64, scratch_operands = 0 : i64, tpu.core_type = #tpu.core_type<tc>, window_params = [{transform_indices = @transform_0, window_bounds = array<i64: 1, 10, 18, 16>}, {pipeline_mode = #tpu.pipeline_mode<synchronous>, transform_indices = @transform_1, window_bounds = array<i64: 9, 32, 16>}, {pipeline_mode = #tpu.pipeline_mode<synchronous>, transform_indices = @transform_2, window_bounds = array<i64: 32, 1>}, {pipeline_mode = #tpu.pipeline_mode<synchronous>, transform_indices = @transform_3, window_bounds = array<i64: 32, 1>}, {transform_indices = @transform_4, window_bounds = array<i64: 1, 32, 1>}, {pipeline_mode = #tpu.pipeline_mode<synchronous>, transform_indices = @transform_5, window_bounds = array<i64: 16, 32>}, {pipeline_mode = #tpu.pipeline_mode<synchronous>, transform_indices = @transform_6, window_bounds = array<i64: 16, 1>}, {transform_indices = @transform_7, window_bounds = array<i64: 1, 32, 128>}, {transform_indices = @transform_8, window_bounds = array<i64: 1, 16, 128>}]} {
    %cst = arith.constant 0.000000e+00 : f32
    %0 = vector.broadcast %cst : f32 to vector<32x128xf32>
    %c0 = arith.constant 0 : index
    %c0_0 = arith.constant 0 : index
    %c0_1 = arith.constant 0 : index
    %c0_2 = arith.constant 0 : index
    %1 = vector.load %arg2[%c0, %c0_0, %c0_1, %c0_2] : memref<1x10x18x16xbf16, #tpu.memory_space<vmem>>, vector<1x8x16x16xbf16>
    %2 = vector.shape_cast %1 : vector<1x8x16x16xbf16> to vector<8x16x16xbf16>
    %3 = vector.shape_cast %2 : vector<8x16x16xbf16> to vector<128x16xbf16>
    %c0_3 = arith.constant 0 : index
    %c0_4 = arith.constant 0 : index
    %c0_5 = arith.constant 0 : index
    %4 = vector.load %arg3[%c0_3, %c0_4, %c0_5] : memref<9x32x16xbf16, #tpu.memory_space<vmem>>, vector<1x32x16xbf16>
    %5 = vector.shape_cast %4 : vector<1x32x16xbf16> to vector<32x16xbf16>
    %cst_6 = arith.constant dense<0.000000e+00> : vector<32x128xf32>
    %6 = tpu.matmul %5, %3, %cst_6 {dimension_numbers = #tpu.dot_dimension_numbers<[1], [1], [0], [0], [0, 0, 1, 0], [], []>} : vector<32x16xbf16>, vector<128x16xbf16>, vector<32x128xf32> -> vector<32x128xf32>
    %7 = arith.addf %0, %6 : vector<32x128xf32>
    %c0_7 = arith.constant 0 : index
    %c0_8 = arith.constant 0 : index
    %c1 = arith.constant 1 : index
    %c0_9 = arith.constant 0 : index
    %8 = vector.load %arg2[%c0_7, %c0_8, %c1, %c0_9] : memref<1x10x18x16xbf16, #tpu.memory_space<vmem>>, vector<1x8x16x16xbf16>
    %9 = vector.shape_cast %8 : vector<1x8x16x16xbf16> to vector<8x16x16xbf16>
    %10 = vector.shape_cast %9 : vector<8x16x16xbf16> to vector<128x16xbf16>
    %c1_10 = arith.constant 1 : index
    %c0_11 = arith.constant 0 : index
    %c0_12 = arith.constant 0 : index
    %11 = vector.load %arg3[%c1_10, %c0_11, %c0_12] : memref<9x32x16xbf16, #tpu.memory_space<vmem>>, vector<1x32x16xbf16>
    %12 = vector.shape_cast %11 : vector<1x32x16xbf16> to vector<32x16xbf16>
    %cst_13 = arith.constant dense<0.000000e+00> : vector<32x128xf32>
    %13 = tpu.matmul %12, %10, %cst_13 {dimension_numbers = #tpu.dot_dimension_numbers<[1], [1], [0], [0], [0, 0, 1, 0], [], []>} : vector<32x16xbf16>, vector<128x16xbf16>, vector<32x128xf32> -> vector<32x128xf32>
    %14 = arith.addf %7, %13 : vector<32x128xf32>
    %c0_14 = arith.constant 0 : index
    %c0_15 = arith.constant 0 : index
    %c2 = arith.constant 2 : index
    %c0_16 = arith.constant 0 : index
    %15 = vector.load %arg2[%c0_14, %c0_15, %c2, %c0_16] : memref<1x10x18x16xbf16, #tpu.memory_space<vmem>>, vector<1x8x16x16xbf16>
    %16 = vector.shape_cast %15 : vector<1x8x16x16xbf16> to vector<8x16x16xbf16>
    %17 = vector.shape_cast %16 : vector<8x16x16xbf16> to vector<128x16xbf16>
    %c2_17 = arith.constant 2 : index
    %c0_18 = arith.constant 0 : index
    %c0_19 = arith.constant 0 : index
    %18 = vector.load %arg3[%c2_17, %c0_18, %c0_19] : memref<9x32x16xbf16, #tpu.memory_space<vmem>>, vector<1x32x16xbf16>
    %19 = vector.shape_cast %18 : vector<1x32x16xbf16> to vector<32x16xbf16>
    %cst_20 = arith.constant dense<0.000000e+00> : vector<32x128xf32>
    %20 = tpu.matmul %19, %17, %cst_20 {dimension_numbers = #tpu.dot_dimension_numbers<[1], [1], [0], [0], [0, 0, 1, 0], [], []>} : vector<32x16xbf16>, vector<128x16xbf16>, vector<32x128xf32> -> vector<32x128xf32>
    %21 = arith.addf %14, %20 : vector<32x128xf32>
    %c0_21 = arith.constant 0 : index
    %c1_22 = arith.constant 1 : index
    %c0_23 = arith.constant 0 : index
    %c0_24 = arith.constant 0 : index
    %22 = vector.load %arg2[%c0_21, %c1_22, %c0_23, %c0_24] : memref<1x10x18x16xbf16, #tpu.memory_space<vmem>>, vector<1x8x16x16xbf16>
    %23 = vector.shape_cast %22 : vector<1x8x16x16xbf16> to vector<8x16x16xbf16>
    %24 = vector.shape_cast %23 : vector<8x16x16xbf16> to vector<128x16xbf16>
    %c3 = arith.constant 3 : index
    %c0_25 = arith.constant 0 : index
    %c0_26 = arith.constant 0 : index
    %25 = vector.load %arg3[%c3, %c0_25, %c0_26] : memref<9x32x16xbf16, #tpu.memory_space<vmem>>, vector<1x32x16xbf16>
    %26 = vector.shape_cast %25 : vector<1x32x16xbf16> to vector<32x16xbf16>
    %cst_27 = arith.constant dense<0.000000e+00> : vector<32x128xf32>
    %27 = tpu.matmul %26, %24, %cst_27 {dimension_numbers = #tpu.dot_dimension_numbers<[1], [1], [0], [0], [0, 0, 1, 0], [], []>} : vector<32x16xbf16>, vector<128x16xbf16>, vector<32x128xf32> -> vector<32x128xf32>
    %28 = arith.addf %21, %27 : vector<32x128xf32>
    %c0_28 = arith.constant 0 : index
    %c1_29 = arith.constant 1 : index
    %c1_30 = arith.constant 1 : index
    %c0_31 = arith.constant 0 : index
    %29 = vector.load %arg2[%c0_28, %c1_29, %c1_30, %c0_31] : memref<1x10x18x16xbf16, #tpu.memory_space<vmem>>, vector<1x8x16x16xbf16>
    %30 = vector.shape_cast %29 : vector<1x8x16x16xbf16> to vector<8x16x16xbf16>
    %31 = vector.shape_cast %30 : vector<8x16x16xbf16> to vector<128x16xbf16>
    %c4 = arith.constant 4 : index
    %c0_32 = arith.constant 0 : index
    %c0_33 = arith.constant 0 : index
    %32 = vector.load %arg3[%c4, %c0_32, %c0_33] : memref<9x32x16xbf16, #tpu.memory_space<vmem>>, vector<1x32x16xbf16>
    %33 = vector.shape_cast %32 : vector<1x32x16xbf16> to vector<32x16xbf16>
    %cst_34 = arith.constant dense<0.000000e+00> : vector<32x128xf32>
    %34 = tpu.matmul %33, %31, %cst_34 {dimension_numbers = #tpu.dot_dimension_numbers<[1], [1], [0], [0], [0, 0, 1, 0], [], []>} : vector<32x16xbf16>, vector<128x16xbf16>, vector<32x128xf32> -> vector<32x128xf32>
    %35 = arith.addf %28, %34 : vector<32x128xf32>
    %c0_35 = arith.constant 0 : index
    %c1_36 = arith.constant 1 : index
    %c2_37 = arith.constant 2 : index
    %c0_38 = arith.constant 0 : index
    %36 = vector.load %arg2[%c0_35, %c1_36, %c2_37, %c0_38] : memref<1x10x18x16xbf16, #tpu.memory_space<vmem>>, vector<1x8x16x16xbf16>
    %37 = vector.shape_cast %36 : vector<1x8x16x16xbf16> to vector<8x16x16xbf16>
    %38 = vector.shape_cast %37 : vector<8x16x16xbf16> to vector<128x16xbf16>
    %c5 = arith.constant 5 : index
    %c0_39 = arith.constant 0 : index
    %c0_40 = arith.constant 0 : index
    %39 = vector.load %arg3[%c5, %c0_39, %c0_40] : memref<9x32x16xbf16, #tpu.memory_space<vmem>>, vector<1x32x16xbf16>
    %40 = vector.shape_cast %39 : vector<1x32x16xbf16> to vector<32x16xbf16>
    %cst_41 = arith.constant dense<0.000000e+00> : vector<32x128xf32>
    %41 = tpu.matmul %40, %38, %cst_41 {dimension_numbers = #tpu.dot_dimension_numbers<[1], [1], [0], [0], [0, 0, 1, 0], [], []>} : vector<32x16xbf16>, vector<128x16xbf16>, vector<32x128xf32> -> vector<32x128xf32>
    %42 = arith.addf %35, %41 : vector<32x128xf32>
    %c0_42 = arith.constant 0 : index
    %c2_43 = arith.constant 2 : index
    %c0_44 = arith.constant 0 : index
    %c0_45 = arith.constant 0 : index
    %43 = vector.load %arg2[%c0_42, %c2_43, %c0_44, %c0_45] : memref<1x10x18x16xbf16, #tpu.memory_space<vmem>>, vector<1x8x16x16xbf16>
    %44 = vector.shape_cast %43 : vector<1x8x16x16xbf16> to vector<8x16x16xbf16>
    %45 = vector.shape_cast %44 : vector<8x16x16xbf16> to vector<128x16xbf16>
    %c6 = arith.constant 6 : index
    %c0_46 = arith.constant 0 : index
    %c0_47 = arith.constant 0 : index
    %46 = vector.load %arg3[%c6, %c0_46, %c0_47] : memref<9x32x16xbf16, #tpu.memory_space<vmem>>, vector<1x32x16xbf16>
    %47 = vector.shape_cast %46 : vector<1x32x16xbf16> to vector<32x16xbf16>
    %cst_48 = arith.constant dense<0.000000e+00> : vector<32x128xf32>
    %48 = tpu.matmul %47, %45, %cst_48 {dimension_numbers = #tpu.dot_dimension_numbers<[1], [1], [0], [0], [0, 0, 1, 0], [], []>} : vector<32x16xbf16>, vector<128x16xbf16>, vector<32x128xf32> -> vector<32x128xf32>
    %49 = arith.addf %42, %48 : vector<32x128xf32>
    %c0_49 = arith.constant 0 : index
    %c2_50 = arith.constant 2 : index
    %c1_51 = arith.constant 1 : index
    %c0_52 = arith.constant 0 : index
    %50 = vector.load %arg2[%c0_49, %c2_50, %c1_51, %c0_52] : memref<1x10x18x16xbf16, #tpu.memory_space<vmem>>, vector<1x8x16x16xbf16>
    %51 = vector.shape_cast %50 : vector<1x8x16x16xbf16> to vector<8x16x16xbf16>
    %52 = vector.shape_cast %51 : vector<8x16x16xbf16> to vector<128x16xbf16>
    %c7 = arith.constant 7 : index
    %c0_53 = arith.constant 0 : index
    %c0_54 = arith.constant 0 : index
    %53 = vector.load %arg3[%c7, %c0_53, %c0_54] : memref<9x32x16xbf16, #tpu.memory_space<vmem>>, vector<1x32x16xbf16>
    %54 = vector.shape_cast %53 : vector<1x32x16xbf16> to vector<32x16xbf16>
    %cst_55 = arith.constant dense<0.000000e+00> : vector<32x128xf32>
    %55 = tpu.matmul %54, %52, %cst_55 {dimension_numbers = #tpu.dot_dimension_numbers<[1], [1], [0], [0], [0, 0, 1, 0], [], []>} : vector<32x16xbf16>, vector<128x16xbf16>, vector<32x128xf32> -> vector<32x128xf32>
    %56 = arith.addf %49, %55 : vector<32x128xf32>
    %c0_56 = arith.constant 0 : index
    %c2_57 = arith.constant 2 : index
    %c2_58 = arith.constant 2 : index
    %c0_59 = arith.constant 0 : index
    %57 = vector.load %arg2[%c0_56, %c2_57, %c2_58, %c0_59] : memref<1x10x18x16xbf16, #tpu.memory_space<vmem>>, vector<1x8x16x16xbf16>
    %58 = vector.shape_cast %57 : vector<1x8x16x16xbf16> to vector<8x16x16xbf16>
    %59 = vector.shape_cast %58 : vector<8x16x16xbf16> to vector<128x16xbf16>
    %c8 = arith.constant 8 : index
    %c0_60 = arith.constant 0 : index
    %c0_61 = arith.constant 0 : index
    %60 = vector.load %arg3[%c8, %c0_60, %c0_61] : memref<9x32x16xbf16, #tpu.memory_space<vmem>>, vector<1x32x16xbf16>
    %61 = vector.shape_cast %60 : vector<1x32x16xbf16> to vector<32x16xbf16>
    %cst_62 = arith.constant dense<0.000000e+00> : vector<32x128xf32>
    %62 = tpu.matmul %61, %59, %cst_62 {dimension_numbers = #tpu.dot_dimension_numbers<[1], [1], [0], [0], [0, 0, 1, 0], [], []>} : vector<32x16xbf16>, vector<128x16xbf16>, vector<32x128xf32> -> vector<32x128xf32>
    %63 = arith.addf %56, %62 : vector<32x128xf32>
    %c0_63 = arith.constant 0 : index
    %c0_64 = arith.constant 0 : index
    %64 = vector.load %arg4[%c0_63, %c0_64] : memref<32x1xf32, #tpu.memory_space<vmem>>, vector<32x1xf32>
    %65 = vector.broadcast %64 : vector<32x1xf32> to vector<32x128xf32>
    %66 = arith.mulf %63, %65 : vector<32x128xf32>
    %c0_65 = arith.constant 0 : index
    %c0_66 = arith.constant 0 : index
    %67 = vector.load %arg5[%c0_65, %c0_66] : memref<32x1xf32, #tpu.memory_space<vmem>>, vector<32x1xf32>
    %68 = vector.broadcast %67 : vector<32x1xf32> to vector<32x128xf32>
    %69 = arith.addf %66, %68 : vector<32x128xf32>
    %cst_67 = arith.constant 0.000000e+00 : f32
    %70 = vector.broadcast %cst_67 : f32 to vector<32x128xf32>
    %71 = arith.maximumf %69, %70 : vector<32x128xf32>
    %72 = arith.truncf %71 : vector<32x128xf32> to vector<32x128xbf16>
    %c0_68 = arith.constant 0 : index
    %c0_69 = arith.constant 0 : index
    %c0_70 = arith.constant 0 : index
    %73 = vector.load %arg9[%c0_68, %c0_69, %c0_70] : memref<1x32x128xbf16, #tpu.memory_space<vmem>>, vector<1x32x128xbf16>
    %74 = vector.shape_cast %73 : vector<1x32x128xbf16> to vector<32x128xbf16>
    %75 = vector.shape_cast %72 : vector<32x128xbf16> to vector<1x32x128xbf16>
    tpu.vector_store %arg9[%c0_68, %c0_69, %c0_70], %75 {strides = array<i32>} : memref<1x32x128xbf16, #tpu.memory_space<vmem>>, vector<1x32x128xbf16>,
    %c0_71 = arith.constant 0 : index
    %c0_72 = arith.constant 0 : index
    %c0_73 = arith.constant 0 : index
    %76 = vector.load %arg6[%c0_71, %c0_72, %c0_73] : memref<1x32x1xf32, #tpu.memory_space<vmem>>, vector<1x32x1xf32>
    %77 = vector.shape_cast %76 : vector<1x32x1xf32> to vector<32x1xf32>
    %78 = vector.broadcast %77 : vector<32x1xf32> to vector<32x128xf32>
    %79 = arith.mulf %71, %78 : vector<32x128xf32>
    %80 = arith.truncf %79 : vector<32x128xf32> to vector<32x128xbf16>
    %c0_74 = arith.constant 0 : index
    %c0_75 = arith.constant 0 : index
    %81 = vector.load %arg7[%c0_74, %c0_75] : memref<16x32xbf16, #tpu.memory_space<vmem>>, vector<16x32xbf16>
    %cst_76 = arith.constant dense<0.000000e+00> : vector<16x128xf32>
    %82 = tpu.matmul %81, %80, %cst_76 {dimension_numbers = #tpu.dot_dimension_numbers<[1], [0], [0], [1], [0, 0, 1, 1], [], []>} : vector<16x32xbf16>, vector<32x128xbf16>, vector<16x128xf32> -> vector<16x128xf32>
    %c0_77 = arith.constant 0 : index
    %c0_78 = arith.constant 0 : index
    %83 = vector.load %arg8[%c0_77, %c0_78] : memref<16x1xf32, #tpu.memory_space<vmem>>, vector<16x1xf32>
    %84 = vector.broadcast %83 : vector<16x1xf32> to vector<16x128xf32>
    %85 = arith.addf %82, %84 : vector<16x128xf32>
    %c0_79 = arith.constant 0 : index
    %c0_80 = arith.constant 0 : index
    %c0_81 = arith.constant 0 : index
    %86 = vector.load %arg10[%c0_79, %c0_80, %c0_81] : memref<1x16x128xf32, #tpu.memory_space<vmem>>, vector<1x16x128xf32>
    %87 = vector.shape_cast %86 : vector<1x16x128xf32> to vector<16x128xf32>
    %88 = vector.shape_cast %85 : vector<16x128xf32> to vector<1x16x128xf32>
    tpu.vector_store %arg10[%c0_79, %c0_80, %c0_81], %88 {strides = array<i32>} : memref<1x16x128xf32, #tpu.memory_space<vmem>>, vector<1x16x128xf32>,
    return
  }
  func.func @transform_0(%arg0: i32, %arg1: i32) -> (i32, i32, i32, i32) {
    %c2_i32 = arith.constant 2 : i32
    %0 = arith.muli %arg0, %c2_i32 : i32
    %1 = arith.addi %0, %arg1 : i32
    %c0_i32 = arith.constant 0 : i32
    %c0_i32_0 = arith.constant 0 : i32
    %c0_i32_1 = arith.constant 0 : i32
    %c0_i32_2 = arith.constant 0 : i32
    return %1, %c0_i32, %c0_i32_0, %c0_i32_1 : i32, i32, i32, i32
  }
  func.func @transform_1(%arg0: i32, %arg1: i32) -> (i32, i32, i32) {
    %c0_i32 = arith.constant 0 : i32
    %c0_i32_0 = arith.constant 0 : i32
    %c0_i32_1 = arith.constant 0 : i32
    %c0_i32_2 = arith.constant 0 : i32
    return %c0_i32, %c0_i32_0, %c0_i32_1 : i32, i32, i32
  }
  func.func @transform_2(%arg0: i32, %arg1: i32) -> (i32, i32) {
    %c0_i32 = arith.constant 0 : i32
    %c0_i32_0 = arith.constant 0 : i32
    %c0_i32_1 = arith.constant 0 : i32
    return %c0_i32, %c0_i32_0 : i32, i32
  }
  func.func @transform_3(%arg0: i32, %arg1: i32) -> (i32, i32) {
    %c0_i32 = arith.constant 0 : i32
    %c0_i32_0 = arith.constant 0 : i32
    %c0_i32_1 = arith.constant 0 : i32
    return %c0_i32, %c0_i32_0 : i32, i32
  }
  func.func @transform_4(%arg0: i32, %arg1: i32) -> (i32, i32, i32) {
    %c0_i32 = arith.constant 0 : i32
    %c0_i32_0 = arith.constant 0 : i32
    %c0_i32_1 = arith.constant 0 : i32
    return %arg0, %c0_i32, %c0_i32_0 : i32, i32, i32
  }
  func.func @transform_5(%arg0: i32, %arg1: i32) -> (i32, i32) {
    %c0_i32 = arith.constant 0 : i32
    %c0_i32_0 = arith.constant 0 : i32
    %c0_i32_1 = arith.constant 0 : i32
    return %c0_i32, %c0_i32_0 : i32, i32
  }
  func.func @transform_6(%arg0: i32, %arg1: i32) -> (i32, i32) {
    %c0_i32 = arith.constant 0 : i32
    %c0_i32_0 = arith.constant 0 : i32
    %c0_i32_1 = arith.constant 0 : i32
    return %c0_i32, %c0_i32_0 : i32, i32
  }
  func.func @transform_7(%arg0: i32, %arg1: i32) -> (i32, i32, i32) {
    %c0_i32 = arith.constant 0 : i32
    %c0_i32_0 = arith.constant 0 : i32
    return %arg0, %c0_i32, %arg1 : i32, i32, i32
  }
  func.func @transform_8(%arg0: i32, %arg1: i32) -> (i32, i32, i32) {
    %c0_i32 = arith.constant 0 : i32
    %c0_i32_0 = arith.constant 0 : i32
    return %arg0, %c0_i32, %arg1 : i32, i32, i32
  }
}

</mosaic_0001>

<bundles_post_ra>
// kernel: camera_aware_depthnet_forward.1
= control target key start
LH: loop header
LB: loop body
LE: loop exit
PB: predicated region body
PF: predicated region fallthrough
CT: control target
= control target key end

     0   :  { %s3115_s27 = smov 0   ;;  %s3117_s28 = smov 0   ;;  %s3868_s0 = inlined_call_operand.vmem [shape: bf16[4,10,18,16], index: 0, kind: input, shape index: {}]   ;;  %s3869_s1 = inlined_call_operand.vmem [shape: bf16[9,32,16], index: 1, kind: input, shape index: {}]   ;;  %s3870_s2 = inlined_call_operand.vmem [shape: f32[32,1], index: 2, kind: input, shape index: {}]   ;;  %s3871_s3 = inlined_call_operand.vmem [shape: f32[32,1], index: 3, kind: input, shape index: {}]   ;;  %s3872_s4 = inlined_call_operand.vmem [shape: f32[2,32,1], index: 4, kind: input, shape index: {}]   ;;  %s3873_s5 = inlined_call_operand.vmem [shape: bf16[16,32], index: 5, kind: input, shape index: {}]   ;;  %s3874_s6 = inlined_call_operand.vmem [shape: f32[16,1], index: 6, kind: input, shape index: {}]   ;;  %s3875_s7 = inlined_call_operand.vmem [shape: bf16[2,32,256], index: 7, kind: output, shape index: {0}]   ;;  %s3876_s8 = inlined_call_operand.vmem [shape: f32[2,16,256], index: 8, kind: output, shape index: {1}]  }
   0x1   :  { %s3119_s29 = smov 0   ;;  %s3121_s30 = smov 0  }
   0x2   :  { %s3123_s9 = smov 0   ;;  %s3125_s10 = smov 0  }
   0x3   :  { %s3127_s11 = smov 0  }
   0x4 LB: > { %s28_s12 = sadd.s32 1, %s3059_s9  ;;  %s31_s13 = sadd.s32 1, %s3063_s10  ;;  %s3067_s11 = sphi %s3127_s11, %s19_s11   ;;  %s3063_s10 = sphi %s3125_s10, %s3887_s10   ;;  %s3059_s9 = sphi %s3123_s9, %s3886_s9   ;;  %s3055_s30 = sphi %s3121_s30, %s3885_s30   ;;  %s3051_s29 = sphi %s3119_s29, %s3884_s29   ;;  %s3047_s28 = sphi %s3117_s28, %s3883_s28   ;;  %s3043_s27 = sphi %s3115_s27, %s3882_s27  }
   0x5   : > { %p29_p0 = scmp.ge.s32.totalorder %s28_s12, 2  ;;  %s2525_s14 = sadd.s32 4294967295, %s3067_s11  }
   0x6   : > { %p211_p1 = scmp.ne.s32.totalorder %s3047_s28, %s3043_s27  ;;  %p212_p2 = scmp.eq.s32.totalorder %s2525_s14, 3 }
   0x7   : > { %s3889_s12 = smov (%p29_p0, %s28_s12), 0  ;;  %s3891_s13 = smov (!%p29_p0, %s31_s13), %s3063_s10 }
   0x8   : > { %s197_s15 = ssub.s32 %s3059_s9, %s3889_s12  ;;  %p33_p3 = scmp.ge.s32.totalorder %s3891_s13, 2 }
   0x9   : > { %p2531_p4 = scmp.ge.s32.totalorder %s3067_s11, 1  ;;  %p3161_p5 = por %p212_p2, %p211_p1 }
   0xa   : > { %p299_p6 = scmp.lt.s32.totalorder %s3067_s11, 5  ;;  %s3893_s13 = smov (%p33_p3, %s3891_s13), 0 }
   0xb   : > { %s196_s17 = ssub.s32 %s3063_s10, %s3893_s13  ;;  %s201_s19 = sadd.s32 1, %s3047_s28 }
   0xc   : > { %p300_p7 = pnand %p2531_p4, %p299_p6  ;;  %s198_s18 = sor.u32 %s197_s15, %s196_s17 }
   0xd   : > { %p199_p8 = scmp.eq.s32.totalorder %s198_s18, 0  ;;  %s2534_s21 = sshll.u32 (!%p300_p7), %s3055_s30, 1 }
   0xe   : > { %303 = sbr.rel (%p300_p7) target bundleno = 559 (0x22f), region = 48  ;;  %s344_s22 = sadd.s32 (!%p300_p7), %s3051_s29, %s2534_s21 }
   0xf   : > { %s3172_s20 = scalar_select %p199_p8, %s3047_s28, %s201_s19  }
  0x10   : > { %p345_p9 = scmp.lt.s32.totalorder (!%p300_p7), %s344_s22, 3  ;;  %p352_p10 = scmp.lt.s32.totalorder (!%p300_p7), %s3055_s30, 1 }
  0x13   : > { %s3895_s22 = smov (!%p345_p9, %s344_s22), 3  ;;  %vm793_vm0 = vcmask 1042432   ;;  %vm794_vm1 = vcmask 1046532   ;;  %vm620_vm2 = vcmask 130048   ;;  %vm386_vm4 = vsmask.f32 3328 }
  0x14   : > { %s2952_s23 = smul.u32 120, %s3895_s22  ;;  %vm3181_vm3 = vmor %vm793_vm0, %vm794_vm1  ;;  %vm387_vm5 = vsmask.f32 7440  ;;  %vm2287_vm7 = vcmask 261120  }
  0x15   : > { %vm3203_vm6 = vmor %vm386_vm4, %vm387_vm5  ;;  %s353_s19 = scalar_select %p352_p10, %s3055_s30, 1 }
  0x16   : > { %s3179_s26 = scalar_lea.vmem %s3868_s0, %s2952_s23 }
  0x17   : > { %v373_v1 = vld [vmem:[%s3179_s26 + $0x58] sm:$0xf]  ;;  %v385_v2 = vld [vmem:[%s3179_s26 + $0x5c] sm:$0x1]  ;;  %v776_v3 = vld [vmem:[%s3179_s26 + $0x54] sm:$0xe] }
  0x18   : > { %v2601_v4 = vrot.slane %v776_v3, 9  ;;  %v847_v5 = vrot.slane %v373_v1, 5  ;;  %v850_v6 = vrot.slane %v385_v2, 5  ;;  %v372_v7 = vld [vmem:[%s3179_s26 + $0x54] sm:$0xf]  ;;  %v567_v8 = vshll.u32 %v373_v1, 16 }
  0x19   : > { %v558_v9 = vshrl.u32 %v372_v7, 16  ;;  %v561_v10 = vshll.u32 %v372_v7, 16  ;;  %v571_v11 = vshrl.u32 %v373_v1, 16  ;;  %v577_v12 = vshll.u32 %v385_v2, 16  ;;  %v2911_v13 = vld [vmem:[%s3179_s26 + $0x60] sm:$0xff]  ;;  %v2897_v14 = vld [vmem:[%s3179_s26 + $0x54] sm:$0xff] }
  0x1a   : > { %v848_v15 = vsel %vm3181_vm3, %v2601_v4, %v847_v5  ;;  %v849_v16 = vrot.slane %v847_v5, 4  ;;  %v569_v17 = vrot.slane %v567_v8, 5  ;;  %v371_v18 = vld [vmem:[%s3179_s26 + $0x4c] sm:$0xf]  ;;  %v384_v19 = vld [vmem:[%s3179_s26 + $0x50] sm:$0x1] }
  0x1b   : > { %v881_v20 = vunpack.c.l.b16 %v848_v15  ;;  %v560_v21 = vrot.slane %v558_v9, 4  ;;  %v563_v22 = vrot.slane %v561_v10, 5  ;;  %v573_v23 = vrot.slane %v571_v11, 4  ;;  %v775_v24 = vld [vmem:[%s3179_s26 + $0x48] sm:$0xe]  ;;  %v2910_v47 = vld [vmem:[%s3179_s26 + $0x54] sm:$0xff] }
  0x1c   : > { %v851_v25 = vsel %vm3181_vm3, %v849_v16, %v850_v6  ;;  %v579_v26 = vrot.slane %v577_v12, 5  ;;  %v1044_v27 = vsel %vm620_vm2, %v2911_v13, 0  ;;  %v748_v28 = vsel %vm620_vm2, %v2897_v14, 0  ;;  %v370_v29 = vld [vmem:[%s3179_s26 + $0x48] sm:$0xf]  ;;  %s2889_s15 = sshll.u32 %s353_s19, 5 }
  0x1d   : > { %v882_v30 = vunpack.c.l.b16 %v851_v25  ;;  %v564_v31 = vor.u32 %v563_v22, %v560_v21  ;;  %v574_v32 = vor.u32 %v573_v23, %v569_v17  ;;  %1046 = vmatpush.bf16.xpose.msra.mxu3 %v1044_v27  ;;  %750 = vmatpush.bf16.xpose.msra.mxu1 %v748_v28  ;;  %v2600_v33 = vrot.slane %v775_v24, 9  ;;  %v2896_v48 = vld [vmem:[%s3179_s26 + $0x48] sm:$0xff]  ;;  %v369_v57 = vld [vmem:[%s3179_s26 + $0x40] sm:$0xf]  ;;  %v774_v58 = vld [vmem:[%s3179_s26 + $0x3c] sm:$0xe]  ;;  %s3775_s23 = scalar_lea.vmem %s3872_s4, %s2889_s15 }
  0x1e   : > { %v840_v35 = vrot.slane %v371_v18, 5  ;;  %v843_v36 = vrot.slane %v384_v19, 5  ;;  %v534_v37 = vshrl.u32 %v370_v29, 16  ;;  %v537_v38 = vshll.u32 %v370_v29, 16  ;;  %v383_v63 = vld [vmem:[%s3179_s26 + $0x44] sm:$0x1] }
  0x1f   : > { %v890_v39 = vpack.c.b16 %v882_v30, %v881_v20  ;;  %v565_v40 = vrot.slane %v564_v31, 4  ;;  %v575_v41 = vrot.slane %v574_v32, 4  ;;  %v543_v42 = vshll.u32 %v371_v18, 16  ;;  %v368_v5 = vld [vmem:[%s3179_s26 + $0x3c] sm:$0xf] }
  0x20   : > { %v841_v43 = vsel %vm3181_vm3, %v2600_v33, %v840_v35  ;;  %v842_v44 = vrot.slane %v840_v35, 4  ;;  %v536_v45 = vrot.slane %v534_v37, 4  ;;  %v539_v46 = vrot.slane %v537_v38, 5  ;;  %v2895_v23 = vld [vmem:[%s3179_s26 + $0x3c] sm:$0xff]  ;;  %v367_v28 = vld [vmem:[%s3179_s26 + $0x34] sm:$0xf] }
  0x21   : > { %v919_v49 = vsel %vm620_vm2, %v890_v39, 0  ;;  %v570_v50 = vsel %vm3203_vm6, %v565_v40, %v569_v17  ;;  %v580_v51 = vsel %vm3203_vm6, %v575_v41, %v579_v26  ;;  %v879_v52 = vunpack.c.l.b16 %v841_v43  ;;  %v773_v33 = vld [vmem:[%s3179_s26 + $0x30] sm:$0xe]  ;;  %v382_v39 = vld [vmem:[%s3179_s26 + $0x38] sm:$0x1] }
  0x22   : > { %921 = vmatpush.bf16.xpose.msra.mxu2 %v919_v49  ;;  %v610_v53 = vunpack.c.l.b16 %v570_v50  ;;  %v611_v54 = vunpack.c.l.b16 %v580_v51  ;;  %v844_v55 = vsel %vm3181_vm3, %v842_v44, %v843_v36  ;;  %v540_v56 = vor.u32 %v539_v46, %v536_v45  ;;  %v366_v40 = vld [vmem:[%s3179_s26 + $0x30] sm:$0xf] }
  0x23   : > { %v880_v59 = vunpack.c.l.b16 %v844_v55  ;;  %v545_v60 = vrot.slane %v543_v42, 5  ;;  %v547_v61 = vshrl.u32 %v371_v18, 16  ;;  %v553_v62 = vshll.u32 %v384_v19, 16  ;;  %v2909_v18 = vld [vmem:[%s3179_s26 + $0x48] sm:$0xff] }
  0x24   : > { %v619_v1 = vpack.c.b16 %v611_v54, %v610_v53  ;;  %v541_v2 = vrot.slane %v540_v56, 4  ;;  %v1041_v3 = vsel %vm620_vm2, %v2910_v47, 0  ;;  %v745_v4 = vsel %vm620_vm2, %v2896_v48, 0 }
  0x25   : > { %v889_v6 = vpack.c.b16 %v880_v59, %v879_v52  ;;  %v549_v7 = vrot.slane %v547_v61, 4  ;;  %v555_v8 = vrot.slane %v553_v62, 5  ;;  %1047 = vmatpush.bf16.xpose.msra.mxu3 %v1041_v3  ;;  %751 = vmatpush.bf16.xpose.msra.mxu1 %v745_v4  ;;  %v2599_v9 = vrot.slane %v774_v58, 9  ;;  %v2894_v58 = vld [vmem:[%s3179_s26 + $0x30] sm:$0xff] }
  0x26   : > { %v649_v10 = vsel %vm620_vm2, %v619_v1, 0  ;;  %v546_v11 = vsel %vm3203_vm6, %v541_v2, %v545_v60  ;;  %v833_v12 = vrot.slane %v369_v57, 5  ;;  %v836_v13 = vrot.slane %v383_v63, 5 }
  0x27   : > { %651 = vmatpush.bf16.xpose.msra.mxu0 %v649_v10  ;;  %v916_v14 = vsel %vm620_vm2, %v889_v6, 0  ;;  %v550_v15 = vor.u32 %v549_v7, %v545_v60  ;;  %v608_v16 = vunpack.c.l.b16 %v546_v11  ;;  %v510_v17 = vshrl.u32 %v368_v5, 16 }
  0x28   : > { %v834_v19 = vsel %vm3181_vm3, %v2599_v9, %v833_v12  ;;  %v835_v20 = vrot.slane %v833_v12, 4  ;;  %v513_v21 = vshll.u32 %v368_v5, 16  ;;  %v519_v22 = vshll.u32 %v369_v57, 16  ;;  %v772_v9 = vld [vmem:[%s3179_s26 + $0x24] sm:$0xe] }
  0x29   : > { %v551_v24 = vrot.slane %v550_v15, 4  ;;  %v877_v25 = vunpack.c.l.b16 %v834_v19  ;;  %v512_v26 = vrot.slane %v510_v17, 4  ;;  %v523_v27 = vshrl.u32 %v369_v57, 16  ;;  %v2908_v57 = vld [vmem:[%s3179_s26 + $0x3c] sm:$0xff]  ;;  %v364_v19 = vld [vmem:[%s3179_s26 + $0x24] sm:$0xf] }
  0x2a   : > { %922 = vmatpush.bf16.xpose.msra.mxu2 %v916_v14  ;;  %v837_v29 = vsel %vm3181_vm3, %v835_v20, %v836_v13  ;;  %v515_v30 = vrot.slane %v513_v21, 5  ;;  %v521_v31 = vrot.slane %v519_v22, 5  ;;  %v529_v32 = vshll.u32 %v383_v63, 16  ;;  %v381_v14 = vld [vmem:[%s3179_s26 + $0x2c] sm:$0x1] }
  0x2b   : > { %v556_v35 = vsel %vm3203_vm6, %v551_v24, %v555_v8  ;;  %v878_v36 = vunpack.c.l.b16 %v837_v29  ;;  %v525_v37 = vrot.slane %v523_v27, 4  ;;  %v1038_v38 = vsel %vm620_vm2, %v2909_v18, 0  ;;  %v365_v8 = vld [vmem:[%s3179_s26 + $0x28] sm:$0xf] }
  0x2c   : > { %v609_v41 = vunpack.c.l.b16 %v556_v35  ;;  %v516_v42 = vor.u32 %v515_v30, %v512_v26  ;;  %v531_v43 = vrot.slane %v529_v32, 5  ;;  %v742_v44 = vsel %vm620_vm2, %v2895_v23, 0 }
  0x2d   : > { %v888_v45 = vpack.c.b16 %v878_v36, %v877_v25  ;;  %v526_v46 = vor.u32 %v525_v37, %v521_v31  ;;  %1048 = vmatpush.bf16.xpose.msra.mxu3 %v1038_v38  ;;  %752 = vmatpush.bf16.xpose.msra.mxu1 %v742_v44  ;;  %v2598_v47 = vrot.slane %v773_v33, 9  ;;  %v826_v48 = vrot.slane %v367_v28, 5  ;;  %v2907_v37 = vld [vmem:[%s3179_s26 + $0x30] sm:$0xff]  ;;  %v2893_v38 = vld [vmem:[%s3179_s26 + $0x24] sm:$0xff] }
  0x2e   : > { %v618_v49 = vpack.c.b16 %v609_v41, %v608_v16  ;;  %v517_v50 = vrot.slane %v516_v42, 4  ;;  %v829_v51 = vrot.slane %v382_v39, 5  ;;  %v486_v52 = vshrl.u32 %v366_v40, 16 }
  0x2f   : > { %v913_v53 = vsel %vm620_vm2, %v888_v45, 0  ;;  %v527_v54 = vrot.slane %v526_v46, 4  ;;  %v827_v55 = vsel %vm3181_vm3, %v2598_v47, %v826_v48  ;;  %v828_v56 = vrot.slane %v826_v48, 4  ;;  %v363_v47 = vld [vmem:[%s3179_s26 + $0x1c] sm:$0xf] }
  0x30   : > { %v646_v59 = vsel %vm620_vm2, %v618_v49, 0  ;;  %v522_v60 = vsel %vm3203_vm6, %v517_v50, %v521_v31  ;;  %v875_v61 = vunpack.c.l.b16 %v827_v55  ;;  %v488_v62 = vrot.slane %v486_v52, 4  ;;  %v771_v48 = vld [vmem:[%s3179_s26 + $0x18] sm:$0xe] }
  0x31   : > { %652 = vmatpush.bf16.xpose.msra.mxu0 %v646_v59  ;;  %v532_v63 = vsel %vm3203_vm6, %v527_v54, %v531_v43  ;;  %v606_v1 = vunpack.c.l.b16 %v522_v60  ;;  %v830_v2 = vsel %vm3181_vm3, %v828_v56, %v829_v51  ;;  %v489_v3 = vshll.u32 %v366_v40, 16 }
  0x32   : > { %923 = vmatpush.bf16.xpose.msra.mxu2 %v913_v53  ;;  %v607_v4 = vunpack.c.l.b16 %v532_v63  ;;  %v876_v5 = vunpack.c.l.b16 %v830_v2  ;;  %v495_v6 = vshll.u32 %v367_v28, 16  ;;  %v499_v7 = vshrl.u32 %v367_v28, 16  ;;  %v380_v53 = vld [vmem:[%s3179_s26 + $0x20] sm:$0x1] }
  0x33   : > { %v491_v10 = vrot.slane %v489_v3, 5  ;;  %v505_v11 = vshll.u32 %v382_v39, 16  ;;  %v1035_v12 = vsel %vm620_vm2, %v2908_v57, 0  ;;  %v739_v13 = vsel %vm620_vm2, %v2894_v58, 0  ;;  %v362_v58 = vld [vmem:[%s3179_s26 + $0x18] sm:$0xf] }
  0x34   : > { %v617_v15 = vpack.c.b16 %v607_v4, %v606_v1  ;;  %v887_v16 = vpack.c.b16 %v876_v5, %v875_v61  ;;  %v497_v17 = vrot.slane %v495_v6, 5  ;;  %v501_v18 = vrot.slane %v499_v7, 4 }
  0x35   : > { %v492_v20 = vor.u32 %v491_v10, %v488_v62  ;;  %v507_v21 = vrot.slane %v505_v11, 5  ;;  %1049 = vmatpush.bf16.xpose.msra.mxu3 %v1035_v12  ;;  %753 = vmatpush.bf16.xpose.msra.mxu1 %v739_v13  ;;  %v2597_v22 = vrot.slane %v772_v9, 9  ;;  %v819_v23 = vrot.slane %v365_v8, 5  ;;  %v2892_v13 = vld [vmem:[%s3179_s26 + $0x18] sm:$0xff] }
  0x36   : > { %v643_v24 = vsel %vm620_vm2, %v617_v15, 0  ;;  %v910_v25 = vsel %vm620_vm2, %v887_v16, 0  ;;  %v502_v26 = vor.u32 %v501_v18, %v497_v17  ;;  %v822_v27 = vrot.slane %v381_v14, 5  ;;  %v770_v18 = vld [vmem:[%s3179_s26 + $0xc] sm:$0xe] }
  0x37   : > { %v493_v28 = vrot.slane %v492_v20, 4  ;;  %v820_v29 = vsel %vm3181_vm3, %v2597_v22, %v819_v23  ;;  %v821_v30 = vrot.slane %v819_v23, 4  ;;  %v462_v31 = vshrl.u32 %v364_v19, 16  ;;  %v361_v23 = vld [vmem:[%s3179_s26 + $0x10] sm:$0xf] }
  0x38   : > { %v503_v32 = vrot.slane %v502_v26, 4  ;;  %v873_v33 = vunpack.c.l.b16 %v820_v29  ;;  %v465_v35 = vshll.u32 %v364_v19, 16  ;;  %v471_v36 = vshll.u32 %v365_v8, 16  ;;  %v379_v29 = vld [vmem:[%s3179_s26 + $0x14] sm:$0x1] }
  0x39   : > { %653 = vmatpush.bf16.xpose.msra.mxu0 %v643_v24  ;;  %v498_v39 = vsel %vm3203_vm6, %v493_v28, %v497_v17  ;;  %v823_v40 = vsel %vm3181_vm3, %v821_v30, %v822_v27  ;;  %v464_v41 = vrot.slane %v462_v31, 4  ;;  %v475_v42 = vshrl.u32 %v365_v8, 16  ;;  %v2906_v8 = vld [vmem:[%s3179_s26 + $0x24] sm:$0xff]  ;;  %v360_v24 = vld [vmem:[%s3179_s26 + $0xc] sm:$0xf] }
  0x3a   : > { %924 = vmatpush.bf16.xpose.msra.mxu2 %v910_v25  ;;  %v508_v43 = vsel %vm3203_vm6, %v503_v32, %v507_v21  ;;  %v604_v44 = vunpack.c.l.b16 %v498_v39  ;;  %v874_v45 = vunpack.c.l.b16 %v823_v40  ;;  %v467_v46 = vrot.slane %v465_v35, 5 }
  0x3b   : > { %v605_v49 = vunpack.c.l.b16 %v508_v43  ;;  %v473_v50 = vrot.slane %v471_v36, 5  ;;  %v477_v51 = vrot.slane %v475_v42, 4  ;;  %v481_v52 = vshll.u32 %v381_v14, 16 }
  0x3c   : > { %v886_v54 = vpack.c.b16 %v874_v45, %v873_v33  ;;  %v468_v55 = vor.u32 %v467_v46, %v464_v41  ;;  %v1032_v56 = vsel %vm620_vm2, %v2907_v37, 0  ;;  %v736_v57 = vsel %vm620_vm2, %v2893_v38, 0 }
  0x3d   : > { %v616_v59 = vpack.c.b16 %v605_v49, %v604_v44  ;;  %v478_v60 = vor.u32 %v477_v51, %v473_v50  ;;  %v483_v61 = vrot.slane %v481_v52, 5  ;;  %1050 = vmatpush.bf16.xpose.msra.mxu3 %v1032_v56  ;;  %754 = vmatpush.bf16.xpose.msra.mxu1 %v736_v57  ;;  %v2596_v62 = vrot.slane %v771_v48, 9  ;;  %v2891_v48 = vld [vmem:[%s3179_s26 + $0xc] sm:$0xff]  ;;  %v359_v57 = vld [vmem:[%s3179_s26 + $0x4] sm:$0xf] }
  0x3e   : > { %v907_v63 = vsel %vm620_vm2, %v886_v54, 0  ;;  %v469_v1 = vrot.slane %v468_v55, 4  ;;  %v812_v2 = vrot.slane %v363_v47, 5  ;;  %v815_v3 = vrot.slane %v380_v53, 5 }
  0x3f   : > { %v640_v4 = vsel %vm620_vm2, %v616_v59, 0  ;;  %v479_v5 = vrot.slane %v478_v60, 4  ;;  %v438_v6 = vshrl.u32 %v362_v58, 16  ;;  %v441_v7 = vshll.u32 %v362_v58, 16  ;;  %v378_v58 = vld [vmem:[%s3179_s26 + $0x8] sm:$0x1] }
  0x40   : > { %v474_v9 = vsel %vm3203_vm6, %v469_v1, %v473_v50  ;;  %v813_v10 = vsel %vm3181_vm3, %v2596_v62, %v812_v2  ;;  %v814_v11 = vrot.slane %v812_v2, 4  ;;  %v447_v12 = vshll.u32 %v363_v47, 16 }
  0x41   : > { %654 = vmatpush.bf16.xpose.msra.mxu0 %v640_v4  ;;  %v484_v14 = vsel %vm3203_vm6, %v479_v5, %v483_v61  ;;  %v602_v15 = vunpack.c.l.b16 %v474_v9  ;;  %v871_v16 = vunpack.c.l.b16 %v813_v10  ;;  %v440_v17 = vrot.slane %v438_v6, 4  ;;  %v2925_v5 = vld [vmem:[%s3179_s26 + $0x6c] sm:$0xff]  ;;  %v358_v10 = vld [vmem:[%s3179_s26] sm:$0xf] }
  0x42   : > { %925 = vmatpush.bf16.xpose.msra.mxu2 %v907_v63  ;;  %v603_v19 = vunpack.c.l.b16 %v484_v14  ;;  %v816_v20 = vsel %vm3181_vm3, %v814_v11, %v815_v3  ;;  %v443_v21 = vrot.slane %v441_v7, 5  ;;  %v449_v22 = vrot.slane %v447_v12, 5  ;;  %v769_v63 = vld [vmem:[%s3179_s26] sm:$0xe] }
  0x43   : > { %v872_v25 = vunpack.c.l.b16 %v816_v20  ;;  %v451_v26 = vshrl.u32 %v363_v47, 16  ;;  %v457_v27 = vshll.u32 %v380_v53, 16  ;;  %v1029_v28 = vsel %vm620_vm2, %v2906_v8, 0  ;;  %v2905_v47 = vld [vmem:[%s3179_s26 + $0x18] sm:$0xff] }
  0x44   : > { %v615_v30 = vpack.c.b16 %v603_v19, %v602_v15  ;;  %v444_v31 = vor.u32 %v443_v21, %v440_v17  ;;  %v733_v32 = vsel %vm620_vm2, %v2892_v13, 0  ;;  %v2595_v33 = vrot.slane %v770_v18, 9 }
  0x45   : > { %v885_v35 = vpack.c.b16 %v872_v25, %v871_v16  ;;  %v453_v36 = vrot.slane %v451_v26, 4  ;;  %v459_v37 = vrot.slane %v457_v27, 5  ;;  %1051 = vmatpush.bf16.xpose.msra.mxu3 %v1029_v28  ;;  %755 = vmatpush.bf16.xpose.msra.mxu1 %v733_v32  ;;  %v805_v38 = vrot.slane %v361_v23, 5  ;;  %v2699_v32 = vld [vmem:[%s3179_s26 + $0x60] sm:$0xf] }
  0x46   : > { %v637_v39 = vsel %vm620_vm2, %v615_v30, 0  ;;  %v445_v40 = vrot.slane %v444_v31, 4  ;;  %v808_v41 = vrot.slane %v379_v29, 5  ;;  %v414_v42 = vshrl.u32 %v360_v24, 16 }
  0x47   : > { %v904_v43 = vsel %vm620_vm2, %v885_v35, 0  ;;  %v454_v44 = vor.u32 %v453_v36, %v449_v22  ;;  %v806_v45 = vsel %vm3181_vm3, %v2595_v33, %v805_v38  ;;  %v807_v46 = vrot.slane %v805_v38, 4 }
  0x48   : > { %v450_v49 = vsel %vm3203_vm6, %v445_v40, %v449_v22  ;;  %v869_v50 = vunpack.c.l.b16 %v806_v45  ;;  %v416_v51 = vrot.slane %v414_v42, 4  ;;  %v417_v52 = vshll.u32 %v360_v24, 16  ;;  %v3330_v42 = vld [vmem:[%s3179_s26 + $0x64] sm:$0xf] }
  0x49   : > { %655 = vmatpush.bf16.xpose.msra.mxu0 %v637_v39  ;;  %v455_v53 = vrot.slane %v454_v44, 4  ;;  %v600_v54 = vunpack.c.l.b16 %v450_v49  ;;  %v809_v55 = vsel %vm3181_vm3, %v807_v46, %v808_v41  ;;  %v423_v56 = vshll.u32 %v361_v23, 16 }
  0x4a   : > { %926 = vmatpush.bf16.xpose.msra.mxu2 %v904_v43  ;;  %v870_v59 = vunpack.c.l.b16 %v809_v55  ;;  %v419_v60 = vrot.slane %v417_v52, 5  ;;  %v427_v61 = vshrl.u32 %v361_v23, 16  ;;  %v433_v62 = vshll.u32 %v379_v29, 16  ;;  %v2904_v23 = vld [vmem:[%s3179_s26 + $0xc] sm:$0xff] }
  0x4b   : > { %v460_v1 = vsel %vm3203_vm6, %v455_v53, %v459_v37  ;;  %v425_v2 = vrot.slane %v423_v56, 5  ;;  %v1026_v3 = vsel %vm620_vm2, %v2905_v47, 0  ;;  %v730_v4 = vsel %vm620_vm2, %v2891_v48, 0  ;;  %v2829_v52 = vld [vmem:[%s3179_s26 + $0x6c] sm:$0xf] }
  0x4c   : > { %v601_v6 = vunpack.c.l.b16 %v460_v1  ;;  %v884_v7 = vpack.c.b16 %v870_v59, %v869_v50  ;;  %v420_v8 = vor.u32 %v419_v60, %v416_v51  ;;  %v429_v9 = vrot.slane %v427_v61, 4  ;;  %v3333_v50 = vld [vmem:[%s3179_s26 + $0x68] sm:$0x1] }
  0x4d   : > { %v435_v11 = vrot.slane %v433_v62, 5  ;;  %1052 = vmatpush.bf16.xpose.msra.mxu3 %v1026_v3  ;;  %756 = vmatpush.bf16.xpose.msra.mxu1 %v730_v4  ;;  %v2594_v12 = vrot.slane %v769_v63, 9  ;;  %v798_v13 = vrot.slane %v359_v57, 5  ;;  %v801_v14 = vrot.slane %v378_v58, 5 }
  0x4e   : > { %v614_v15 = vpack.c.b16 %v601_v6, %v600_v54  ;;  %v901_v16 = vsel %vm620_vm2, %v884_v7, 0  ;;  %v421_v17 = vrot.slane %v420_v8, 4  ;;  %v430_v18 = vor.u32 %v429_v9, %v425_v2  ;;  %v3347_v6 = vld [vmem:[%s3179_s26 + $0x74] sm:$0x1] }
  0x4f   : > { %v799_v19 = vsel %vm3181_vm3, %v2594_v12, %v798_v13  ;;  %v800_v20 = vrot.slane %v798_v13, 4  ;;  %v1657_v21 = vsel %vm620_vm2, %v2925_v5, 0  ;;  %v390_v22 = vshrl.u32 %v358_v10, 16  ;;  %v3344_v5 = vld [vmem:[%s3179_s26 + $0x70] sm:$0xf] }
  0x50   : > { %v634_v24 = vsel %vm620_vm2, %v614_v15, 0  ;;  %v426_v25 = vsel %vm3203_vm6, %v421_v17, %v425_v2  ;;  %v431_v26 = vrot.slane %v430_v18, 4  ;;  %v867_v27 = vunpack.c.l.b16 %v799_v19 }
  0x51   : > { %656 = vmatpush.bf16.xpose.msra.mxu0 %v634_v24  ;;  %v598_v28 = vunpack.c.l.b16 %v426_v25  ;;  %v802_v29 = vsel %vm3181_vm3, %v800_v20, %v801_v14  ;;  %v392_v30 = vrot.slane %v390_v22, 4  ;;  %v393_v31 = vshll.u32 %v358_v10, 16  ;;  %v2723_v25 = vld [vmem:[%s3179_s26 + $0x60] sm:$0xe] }
  0x52   : > { %927 = vmatpush.bf16.xpose.msra.mxu2 %v901_v16  ;;  %v436_v33 = vsel %vm3203_vm6, %v431_v26, %v435_v11  ;;  %v868_v35 = vunpack.c.l.b16 %v802_v29  ;;  %v399_v36 = vshll.u32 %v359_v57, 16  ;;  %v403_v37 = vshrl.u32 %v359_v57, 16  ;;  %v2890_v16 = vld [vmem:[%s3179_s26] sm:$0xff] }
  0x53   : > { %v599_v38 = vunpack.c.l.b16 %v436_v33  ;;  %v395_v39 = vrot.slane %v393_v31, 5  ;;  %v409_v40 = vshll.u32 %v378_v58, 16  ;;  %v1023_v41 = vsel %vm620_vm2, %v2904_v23, 0  ;;  %v2924_v26 = vld [vmem:[%s3179_s26 + $0x60] sm:$0xff]  ;;  %v2696_v31 = vld [vmem:[%s3179_s26 + $0x54] sm:$0xf] }
  0x54   : > { %v883_v43 = vpack.c.b16 %v868_v35, %v867_v27  ;;  %v401_v44 = vrot.slane %v399_v36, 5  ;;  %v405_v45 = vrot.slane %v403_v37, 4  ;;  %v1262_v46 = vshrl.u32 %v2699_v32, 16 }
  0x55   : > { %v613_v47 = vpack.c.b16 %v599_v38, %v598_v28  ;;  %v396_v48 = vor.u32 %v395_v39, %v392_v30  ;;  %v411_v49 = vrot.slane %v409_v40, 5  ;;  %1053 = vmatpush.bf16.xpose.msra.mxu3 %v1023_v41  ;;  %v1265_v51 = vshll.u32 %v2699_v32, 16 }
  0x56   : > { %v898_v53 = vsel %vm620_vm2, %v883_v43, 0  ;;  %v406_v54 = vor.u32 %v405_v45, %v401_v44  ;;  %v1264_v55 = vrot.slane %v1262_v46, 4  ;;  %v1271_v56 = vshll.u32 %v3330_v42, 16  ;;  %v3371_v45 = vld [vmem:[%s3179_s26 + $0x58] sm:$0xf] }
  0x57   : > { %v631_v57 = vsel %vm620_vm2, %v613_v47, 0  ;;  %v397_v58 = vrot.slane %v396_v48, 4  ;;  %v1267_v59 = vrot.slane %v1265_v51, 5  ;;  %v1275_v60 = vshrl.u32 %v3330_v42, 16 }
  0x58   : > { %v407_v61 = vrot.slane %v406_v54, 4  ;;  %v1273_v62 = vrot.slane %v1271_v56, 5  ;;  %v1281_v63 = vshll.u32 %v3333_v50, 16  ;;  %v1875_v1 = vshrl.u32 %v2829_v52, 16 }
  0x59   : > { %657 = vmatpush.bf16.xpose.msra.mxu0 %v631_v57  ;;  %v402_v2 = vsel %vm3203_vm6, %v397_v58, %v401_v44  ;;  %v1268_v3 = vor.u32 %v1267_v59, %v1264_v55  ;;  %v1277_v4 = vrot.slane %v1275_v60, 4  ;;  %v1878_v7 = vshll.u32 %v2829_v52, 16  ;;  %v3376_v52 = vld [vmem:[%s3179_s26 + $0x5c] sm:$0x1] }
  0x5a   : > { %928 = vmatpush.bf16.xpose.msra.mxu2 %v898_v53  ;;  %v412_v8 = vsel %vm3203_vm6, %v407_v61, %v411_v49  ;;  %v596_v9 = vunpack.c.l.b16 %v402_v2  ;;  %v1283_v10 = vrot.slane %v1281_v63, 5  ;;  %v1877_v11 = vrot.slane %v1875_v1, 4  ;;  %v3388_v1 = vld [vmem:[%s3179_s26 + $0x64] sm:$0xf] }
  0x5b   : > { %v597_v12 = vunpack.c.l.b16 %v412_v8  ;;  %v1269_v13 = vrot.slane %v1268_v3, 4  ;;  %v1278_v14 = vor.u32 %v1277_v4, %v1273_v62  ;;  %v1880_v15 = vrot.slane %v1878_v7, 5 }
  0x5c   : > { %v1884_v17 = vshll.u32 %v3344_v5, 16  ;;  %v1888_v18 = vshrl.u32 %v3344_v5, 16  ;;  %v1894_v19 = vshll.u32 %v3347_v6, 16  ;;  %v2076_v20 = vrot.slane %v3347_v6, 5 }
  0x5d   : > { %v612_v22 = vpack.c.b16 %v597_v12, %v596_v9  ;;  %v1274_v23 = vsel %vm3203_vm6, %v1269_v13, %v1273_v62  ;;  %v1279_v24 = vrot.slane %v1278_v14, 4  ;;  %v727_v36 = vsel %vm620_vm2, %v2890_v16, 0 }
  0x5e   : > { %v1314_v27 = vunpack.c.l.b16 %v1274_v23  ;;  %v1886_v28 = vrot.slane %v1884_v17, 5  ;;  %v1890_v29 = vrot.slane %v1888_v18, 4  ;;  %v1896_v30 = vrot.slane %v1894_v19, 5  ;;  %757 = vmatpush.bf16.xpose.msra.mxu1 %v727_v36  ;;  %v2722_v17 = vld [vmem:[%s3179_s26 + $0x54] sm:$0xe] }
  0x5f   : > { %v628_v32 = vsel %vm620_vm2, %v612_v22, 0  ;;  %v1284_v33 = vsel %vm3203_vm6, %v1279_v24, %v1283_v10  ;;  %v2731_v39 = vrot.slane %v2723_v25, 9  ;;  %v1460_v40 = vrot.slane %v3330_v42, 5 }
  0x60   : > { %v1315_v37 = vunpack.c.l.b16 %v1284_v33  ;;  %v1891_v38 = vor.u32 %v1890_v29, %v1886_v28  ;;  %v1463_v43 = vrot.slane %v3333_v50, 5  ;;  %v1654_v44 = vsel %vm620_vm2, %v2924_v26, 0  ;;  %v2826_v50 = vld [vmem:[%s3179_s26 + $0x60] sm:$0xf] }
  0x61   : > { %658 = vmatpush.bf16.xpose.msra.mxu0 %v628_v32  ;;  %v1238_v46 = vshrl.u32 %v2696_v31, 16  ;;  %v1461_v51 = vsel %vm3181_vm3, %v2731_v39, %v1460_v40  ;;  %v1462_v42 = vrot.slane %v1460_v40, 4  ;;  %v1241_v55 = vshll.u32 %v2696_v31, 16  ;;  %v2693_v32 = vld [vmem:[%s3179_s26 + $0x48] sm:$0xf] }
  0x62   : > { %1659 = vmatpush.bf16.xpose.msrb.mxu2 %v1657_v21  ;;  %v1881_v21 = vor.u32 %v1880_v15, %v1877_v11  ;;  %v1323_v47 = vpack.c.b16 %v1315_v37, %v1314_v27  ;;  %v1892_v48 = vrot.slane %v1891_v38, 4  ;;  %v1494_v53 = vunpack.c.l.b16 %v1461_v51  ;;  %v3391_v11 = vld [vmem:[%s3179_s26 + $0x68] sm:$0x1]  ;;  %v2923_v27 = vld [vmem:[%s3179_s26 + $0x54] sm:$0xff] }
  0x63   : > { %v1240_v54 = vrot.slane %v1238_v46, 4  ;;  %v1247_v58 = vshll.u32 %v3371_v45, 16  ;;  %v1251_v59 = vshrl.u32 %v3371_v45, 16  ;;  %v1464_v61 = vsel %vm3181_vm3, %v1462_v42, %v1463_v43 }
  0x64   : > { %v1882_v35 = vrot.slane %v1881_v21, 4  ;;  %v1352_v56 = vsel %vm620_vm2, %v1323_v47, 0  ;;  %v1897_v57 = vsel %vm3203_vm6, %v1892_v48, %v1896_v30  ;;  %v1243_v62 = vrot.slane %v1241_v55, 5  ;;  %v3411_v47 = vld [vmem:[%s3179_s26 + $0x4c] sm:$0xf] }
  0x65   : > { %v1928_v60 = vunpack.c.l.b16 %v1897_v57  ;;  %v1257_v63 = vshll.u32 %v3376_v52, 16  ;;  %v1495_v2 = vunpack.c.l.b16 %v1464_v61  ;;  %v1249_v3 = vrot.slane %v1247_v58, 5  ;;  %v2902_v57 = vld [vmem:[%s3869_s1 + $0x20] sm:$0xff]  ;;  %v2900_v58 = vld [vmem:[%s3869_s1 + $0x10] sm:$0xff] }
  0x66   : > { %v1887_v41 = vsel %vm3203_vm6, %v1882_v35, %v1886_v28  ;;  %v1253_v4 = vrot.slane %v1251_v59, 4  ;;  %v1851_v7 = vshrl.u32 %v2826_v50, 16  ;;  %v1244_v9 = vor.u32 %v1243_v62, %v1240_v54  ;;  %2614 = vmatmul.msk.bf16.vlgmr.msra.gmra.mxu2 %vm620_vm2, %v2902_v57 }
  0x67   : > { %v1927_v49 = vunpack.c.l.b16 %v1887_v41  ;;  %v1259_v10 = vrot.slane %v1257_v63, 5  ;;  %v1854_v12 = vshll.u32 %v2826_v50, 16  ;;  %v1503_v13 = vpack.c.b16 %v1495_v2, %v1494_v53  ;;  %v3416_v53 = vld [vmem:[%s3179_s26 + $0x50] sm:$0x1] }
  0x68   : > { %v1254_v14 = vor.u32 %v1253_v4, %v1249_v3  ;;  %v1853_v15 = vrot.slane %v1851_v7, 4  ;;  %v1860_v16 = vshll.u32 %v3388_v1, 16  ;;  %v1245_v19 = vrot.slane %v1244_v9, 4  ;;  %v2912_v63 = vld [vmem:[%s3869_s1 + $0x30] sm:$0xff]  ;;  %2550 = vmatmul.msk.bf16.vlgmr.msra.gmra.mxu0 %vm620_vm2, %v2900_v58 }
  0x69   : > { %1354 = vmatpush.bf16.xpose.msrb.mxu0 %v1352_v56  ;;  %v1936_v8 = vpack.c.b16 %v1928_v60, %v1927_v49  ;;  %v1856_v22 = vrot.slane %v1854_v12, 5  ;;  %v1864_v23 = vshrl.u32 %v3388_v1, 16  ;;  %v1532_v24 = vsel %vm620_vm2, %v1503_v13, 0  ;;  %v2823_v56 = vld [vmem:[%s3179_s26 + $0x54] sm:$0xf]  ;;  %2676 = vmatmul.msk.bf16.vlgmr.msra.gmra.mxu3 %vm620_vm2, %v2912_v63  ;;  %v2898_v63 = vld [vmem:[%s3869_s1] sm:$0xff] }
  0x6a   : > { %1660 = vmatpush.bf16.xpose.msrb.mxu2 %v1654_v44  ;;  %v1255_v21 = vrot.slane %v1254_v14, 4  ;;  %v1862_v25 = vrot.slane %v1860_v16, 5  ;;  %v1870_v26 = vshll.u32 %v3391_v11, 16  ;;  %1534 = vmatpush.bf16.xpose.msrb.mxu1 %v1532_v24  ;;  %v1250_v28 = vsel %vm3203_vm6, %v1245_v19, %v1249_v3  ;;  %v2721_v19 = vld [vmem:[%s3179_s26 + $0x48] sm:$0xe] }
  0x6b   : > { %v1965_v18 = vsel %vm620_vm2, %v1936_v8, 0  ;;  %v1857_v29 = vor.u32 %v1856_v22, %v1853_v15  ;;  %v1866_v30 = vrot.slane %v1864_v23, 4  ;;  %v2730_v31 = vrot.slane %v2722_v17, 9  ;;  %v3437_v8 = vld [vmem:[%s3179_s26 + $0x58] sm:$0xf]  ;;  %2592 = vmatmul.msk.bf16.vlgmr.msra.gmra.mxu1 %vm620_vm2, %v2898_v63 }
  0x6c   : > { %1967 = vmatpush.bf16.xpose.msrb.mxu3 %v1965_v18  ;;  %v1260_v33 = vsel %vm3203_vm6, %v1255_v21, %v1259_v10  ;;  %v1312_v35 = vunpack.c.l.b16 %v1250_v28  ;;  %v1872_v36 = vrot.slane %v1870_v26, 5  ;;  %v1453_v37 = vrot.slane %v3371_v45, 5  ;;  %v3443_v18 = vld [vmem:[%s3179_s26 + $0x5c] sm:$0x1] }
  0x6d   : > { %v1313_v38 = vunpack.c.l.b16 %v1260_v33  ;;  %v1858_v39 = vrot.slane %v1857_v29, 4  ;;  %v1867_v40 = vor.u32 %v1866_v30, %v1862_v25  ;;  %v1456_v41 = vrot.slane %v3376_v52, 5  ;;  %v2922_v33 = vld [vmem:[%s3179_s26 + $0x48] sm:$0xff] }
  0x6e   : > { %v1454_v43 = vsel %vm3181_vm3, %v2730_v31, %v1453_v37  ;;  %v1455_v44 = vrot.slane %v1453_v37, 4  ;;  %v1651_v46 = vsel %vm620_vm2, %v2923_v27, 0  ;;  %v1214_v48 = vshrl.u32 %v2693_v32, 16 }
  0x6f   : > { %v1322_v49 = vpack.c.b16 %v1313_v38, %v1312_v35  ;;  %v1863_v51 = vsel %vm3203_vm6, %v1858_v39, %v1862_v25  ;;  %v1868_v45 = vrot.slane %v1867_v40, 4  ;;  %v1492_v42 = vunpack.c.l.b16 %v1454_v43 }
  0x70   : > { %v1925_v52 = vunpack.c.l.b16 %v1863_v51  ;;  %v1457_v54 = vsel %vm3181_vm3, %v1455_v44, %v1456_v41  ;;  %v1216_v55 = vrot.slane %v1214_v48, 4  ;;  %v1217_v50 = vshll.u32 %v2693_v32, 16  ;;  %v2690_v44 = vld [vmem:[%s3179_s26 + $0x3c] sm:$0xf] }
  0x71   : > { %v1349_v59 = vsel %vm620_vm2, %v1322_v49, 0  ;;  %v1873_v60 = vsel %vm3203_vm6, %v1868_v45, %v1872_v36  ;;  %v1493_v61 = vunpack.c.l.b16 %v1457_v54  ;;  %v1223_v62 = vshll.u32 %v3411_v47, 16  ;;  %v3462_v45 = vld [vmem:[%s3179_s26 + $0x40] sm:$0xf] }
  0x72   : > { %1661 = vmatpush.bf16.xpose.msrb.mxu2 %v1651_v46  ;;  %1355 = vmatpush.bf16.xpose.msrb.mxu0 %v1349_v59  ;;  %v1926_v2 = vunpack.c.l.b16 %v1873_v60  ;;  %v1219_v3 = vrot.slane %v1217_v50, 5  ;;  %v1227_v4 = vshrl.u32 %v3411_v47, 16  ;;  %v1233_v7 = vshll.u32 %v3416_v53, 16 }
  0x73   : > { %v1502_v9 = vpack.c.b16 %v1493_v61, %v1492_v42  ;;  %v1225_v10 = vrot.slane %v1223_v62, 5  ;;  %v1827_v12 = vshrl.u32 %v2823_v56, 16  ;;  %v1830_v13 = vshll.u32 %v2823_v56, 16  ;;  %v2820_v62 = vld [vmem:[%s3179_s26 + $0x48] sm:$0xf] }
  0x74   : > { %v1935_v14 = vpack.c.b16 %v1926_v2, %v1925_v52  ;;  %v1220_v15 = vor.u32 %v1219_v3, %v1216_v55  ;;  %v1229_v16 = vrot.slane %v1227_v4, 4  ;;  %v1235_v17 = vrot.slane %v1233_v7, 5 }
  0x75   : > { %v1529_v22 = vsel %vm620_vm2, %v1502_v9, 0  ;;  %v1829_v23 = vrot.slane %v1827_v12, 4  ;;  %v1832_v24 = vrot.slane %v1830_v13, 5  ;;  %v1836_v21 = vshll.u32 %v3437_v8, 16 }
  0x76   : > { %v1962_v25 = vsel %vm620_vm2, %v1935_v14, 0  ;;  %1535 = vmatpush.bf16.xpose.msrb.mxu1 %v1529_v22  ;;  %v1221_v26 = vrot.slane %v1220_v15, 4  ;;  %v1230_v27 = vor.u32 %v1229_v16, %v1225_v10  ;;  %v1840_v28 = vshrl.u32 %v3437_v8, 16  ;;  %v3483_v14 = vld [vmem:[%s3179_s26 + $0x4c] sm:$0xf] }
  0x77   : > { %1968 = vmatpush.bf16.xpose.msrb.mxu3 %v1962_v25  ;;  %v1833_v29 = vor.u32 %v1832_v24, %v1829_v23  ;;  %v1838_v30 = vrot.slane %v1836_v21, 5  ;;  %v1846_v31 = vshll.u32 %v3443_v18, 16  ;;  %v2729_v32 = vrot.slane %v2721_v19, 9  ;;  %v3487_v19 = vld [vmem:[%s3179_s26 + $0x50] sm:$0x1] }
  0x78   : > { %v1226_v35 = vsel %vm3203_vm6, %v1221_v26, %v1225_v10  ;;  %v1231_v36 = vrot.slane %v1230_v27, 4  ;;  %v1842_v37 = vrot.slane %v1840_v28, 4  ;;  %v1446_v38 = vrot.slane %v3411_v47, 5  ;;  %v2720_v26 = vld [vmem:[%s3179_s26 + $0x3c] sm:$0xe] }
  0x79   : > { %v1310_v39 = vunpack.c.l.b16 %v1226_v35  ;;  %v1834_v40 = vrot.slane %v1833_v29, 4  ;;  %v1848_v41 = vrot.slane %v1846_v31, 5  ;;  %v1449_v43 = vrot.slane %v3416_v53, 5  ;;  %v3468_v53 = vld [vmem:[%s3179_s26 + $0x44] sm:$0x1] }
  0x7a   : > { %v1236_v46 = vsel %vm3203_vm6, %v1231_v36, %v1235_v17  ;;  %v1843_v48 = vor.u32 %v1842_v37, %v1838_v30  ;;  %v1447_v49 = vsel %vm3181_vm3, %v2729_v32, %v1446_v38  ;;  %v1448_v51 = vrot.slane %v1446_v38, 4 }
  0x7b   : > { %v1311_v42 = vunpack.c.l.b16 %v1236_v46  ;;  %v1839_v47 = vsel %vm3203_vm6, %v1834_v40, %v1838_v30  ;;  %v1490_v52 = vunpack.c.l.b16 %v1447_v49  ;;  %v1648_v54 = vsel %vm620_vm2, %v2922_v33, 0  ;;  %v2921_v40 = vld [vmem:[%s3179_s26 + $0x3c] sm:$0xff] }
  0x7c   : > { %v1844_v55 = vrot.slane %v1843_v48, 4  ;;  %v1923_v50 = vunpack.c.l.b16 %v1839_v47  ;;  %v1450_v56 = vsel %vm3181_vm3, %v1448_v51, %v1449_v43  ;;  %1662 = vmatpush.bf16.xpose.msrb.mxu2 %v1648_v54  ;;  %v1190_v57 = vshrl.u32 %v2690_v44, 16  ;;  %v2687_v48 = vld [vmem:[%s3179_s26 + $0x30] sm:$0xf] }
  0x7d   : > { %v1321_v58 = vpack.c.b16 %v1311_v42, %v1310_v39  ;;  %v1491_v59 = vunpack.c.l.b16 %v1450_v56  ;;  %v1193_v60 = vshll.u32 %v2690_v44, 16  ;;  %v1199_v61 = vshll.u32 %v3462_v45, 16 }
  0x7e   : > { %v1849_v2 = vsel %vm3203_vm6, %v1844_v55, %v1848_v41  ;;  %v1192_v3 = vrot.slane %v1190_v57, 4  ;;  %v1203_v4 = vshrl.u32 %v3462_v45, 16  ;;  %v1209_v7 = vshll.u32 %v3468_v53, 16 }
  0x7f   : > { %v1346_v9 = vsel %vm620_vm2, %v1321_v58, 0  ;;  %v1924_v10 = vunpack.c.l.b16 %v1849_v2  ;;  %v1501_v12 = vpack.c.b16 %v1491_v59, %v1490_v52  ;;  %v1195_v13 = vrot.slane %v1193_v60, 5  ;;  %v2688_v58 = vld [vmem:[%s3179_s26 + $0x34] sm:$0xf]  ;;  %v2817_v2 = vld [vmem:[%s3179_s26 + $0x3c] sm:$0xf] }
  0x80   : > { %1356 = vmatpush.bf16.xpose.msrb.mxu0 %v1346_v9  ;;  %v1201_v15 = vrot.slane %v1199_v61, 5  ;;  %v1205_v16 = vrot.slane %v1203_v4, 4  ;;  %v1211_v17 = vrot.slane %v1209_v7, 5  ;;  %v1803_v22 = vshrl.u32 %v2820_v62, 16 }
  0x81   : > { %v1934_v23 = vpack.c.b16 %v1924_v10, %v1923_v50  ;;  %v1526_v24 = vsel %vm620_vm2, %v1501_v12, 0  ;;  %v1196_v21 = vor.u32 %v1195_v13, %v1192_v3  ;;  %v1806_v25 = vshll.u32 %v2820_v62, 16  ;;  %v3512_v62 = vld [vmem:[%s3179_s26 + $0x38] sm:$0x1]  ;;  %v2903_v10 = vld [vmem:[%s3869_s1 + $0x28] sm:$0xff] }
  0x82   : > { %1536 = vmatpush.bf16.xpose.msrb.mxu1 %v1526_v24  ;;  %v1206_v27 = vor.u32 %v1205_v16, %v1201_v15  ;;  %v1805_v28 = vrot.slane %v1803_v22, 4  ;;  %v1812_v29 = vshll.u32 %v3483_v14, 16  ;;  %v1816_v30 = vshrl.u32 %v3483_v14, 16  ;;  %v2901_v12 = vld [vmem:[%s3869_s1 + $0x18] sm:$0xff]  ;;  %2615 = vmatmul.msk.bf16.gmra.mxu2 %vm620_vm2, %v2903_v10  ;;  %v3561_v10 = vld [vmem:[%s3179_s26 + $0x2c] sm:$0x1] }
  0x83   : > { %v1959_v31 = vsel %vm620_vm2, %v1934_v23, 0  ;;  %v1197_v32 = vrot.slane %v1196_v21, 4  ;;  %v1808_v33 = vrot.slane %v1806_v25, 5  ;;  %v1822_v35 = vshll.u32 %v3487_v19, 16  ;;  %v2913_v22 = vld [vmem:[%s3869_s1 + $0x38] sm:$0xff]  ;;  %2551 = vmatmul.msk.bf16.gmra.mxu0 %vm620_vm2, %v2901_v12 }
  0x84   : > { %1969 = vmatpush.bf16.xpose.msrb.mxu3 %v1959_v31  ;;  %v1207_v36 = vrot.slane %v1206_v27, 4  ;;  %v1814_v37 = vrot.slane %v1812_v29, 5  ;;  %v1818_v38 = vrot.slane %v1816_v30, 4  ;;  %v2728_v39 = vrot.slane %v2720_v26, 9  ;;  %v3529_v25 = vld [vmem:[%s3179_s26 + $0x40] sm:$0xf] }
  0x85   : > { %v1202_v41 = vsel %vm3203_vm6, %v1197_v32, %v1201_v15  ;;  %v1809_v43 = vor.u32 %v1808_v33, %v1805_v28  ;;  %v1824_v44 = vrot.slane %v1822_v35, 5  ;;  %v1439_v46 = vrot.slane %v3462_v45, 5  ;;  %v3533_v30 = vld [vmem:[%s3179_s26 + $0x44] sm:$0x1]  ;;  %v2719_v32 = vld [vmem:[%s3179_s26 + $0x30] sm:$0xe]  ;;  %2677 = vmatmul.msk.bf16.gmra.mxu3 %vm620_vm2, %v2913_v22 }
  0x86   : > { %v1212_v49 = vsel %vm3203_vm6, %v1207_v36, %v1211_v17  ;;  %v1308_v51 = vunpack.c.l.b16 %v1202_v41  ;;  %v1819_v42 = vor.u32 %v1818_v38, %v1814_v37  ;;  %v1442_v47 = vrot.slane %v3468_v53, 5 }
  0x87   : > { %v1309_v52 = vunpack.c.l.b16 %v1212_v49  ;;  %v1810_v54 = vrot.slane %v1809_v43, 4  ;;  %v1440_v55 = vsel %vm3181_vm3, %v2728_v39, %v1439_v46  ;;  %v1441_v50 = vrot.slane %v1439_v46, 4  ;;  %v2920_v49 = vld [vmem:[%s3179_s26 + $0x30] sm:$0xff] }
  0x88   : > { %v1820_v56 = vrot.slane %v1819_v42, 4  ;;  %v1488_v57 = vunpack.c.l.b16 %v1440_v55  ;;  %v1645_v45 = vsel %vm620_vm2, %v2921_v40, 0  ;;  %v1166_v59 = vshrl.u32 %v2687_v48, 16 }
  0x89   : > { %v1320_v60 = vpack.c.b16 %v1309_v52, %v1308_v51  ;;  %v1815_v61 = vsel %vm3203_vm6, %v1810_v54, %v1814_v37  ;;  %v1443_v53 = vsel %vm3181_vm3, %v1441_v50, %v1442_v47  ;;  %1663 = vmatpush.bf16.xpose.msrb.mxu2 %v1645_v45  ;;  %v1169_v63 = vshll.u32 %v2687_v48, 16 }
  0x8a   : > { %v1825_v3 = vsel %vm3203_vm6, %v1820_v56, %v1824_v44  ;;  %v1921_v4 = vunpack.c.l.b16 %v1815_v61  ;;  %v1489_v7 = vunpack.c.l.b16 %v1443_v53  ;;  %v1168_v9 = vrot.slane %v1166_v59, 4 }
  0x8b   : > { %v1343_v13 = vsel %vm620_vm2, %v1320_v60, 0  ;;  %v1922_v15 = vunpack.c.l.b16 %v1825_v3  ;;  %v1171_v16 = vrot.slane %v1169_v63, 5  ;;  %v1175_v17 = vshll.u32 %v2688_v58, 16  ;;  %v3554_v3 = vld [vmem:[%s3179_s26 + $0x28] sm:$0xf] }
  0x8c   : > { %1357 = vmatpush.bf16.xpose.msrb.mxu0 %v1343_v13  ;;  %v1500_v23 = vpack.c.b16 %v1489_v7, %v1488_v57  ;;  %v1179_v24 = vshrl.u32 %v2688_v58, 16  ;;  %v1185_v21 = vshll.u32 %v3512_v62, 16  ;;  %v1779_v26 = vshrl.u32 %v2817_v2, 16  ;;  %v2684_v57 = vld [vmem:[%s3179_s26 + $0x24] sm:$0xf] }
  0x8d   : > { %v1933_v27 = vpack.c.b16 %v1922_v15, %v1921_v4  ;;  %v1172_v28 = vor.u32 %v1171_v16, %v1168_v9  ;;  %v1177_v29 = vrot.slane %v1175_v17, 5  ;;  %v1782_v31 = vshll.u32 %v2817_v2, 16 }
  0x8e   : > { %v1523_v33 = vsel %vm620_vm2, %v1500_v23, 0  ;;  %v1181_v35 = vrot.slane %v1179_v24, 4  ;;  %v1187_v36 = vrot.slane %v1185_v21, 5  ;;  %v1781_v37 = vrot.slane %v1779_v26, 4  ;;  %v2814_v21 = vld [vmem:[%s3179_s26 + $0x30] sm:$0xf] }
  0x8f   : > { %v1956_v38 = vsel %vm620_vm2, %v1933_v27, 0  ;;  %1537 = vmatpush.bf16.xpose.msrb.mxu1 %v1523_v33  ;;  %v1173_v39 = vrot.slane %v1172_v28, 4  ;;  %v1784_v40 = vrot.slane %v1782_v31, 5  ;;  %v1788_v41 = vshll.u32 %v3529_v25, 16  ;;  %v2899_v26 = vld [vmem:[%s3869_s1 + $0x8] sm:$0xff] }
  0x90   : > { %1970 = vmatpush.bf16.xpose.msrb.mxu3 %v1956_v38  ;;  %v1182_v43 = vor.u32 %v1181_v35, %v1177_v29  ;;  %v1792_v44 = vshrl.u32 %v3529_v25, 16  ;;  %v1798_v46 = vshll.u32 %v3533_v30, 16  ;;  %v2727_v48 = vrot.slane %v2719_v32, 9  ;;  %v3573_v32 = vld [vmem:[%s3179_s26 + $0x34] sm:$0xf]  ;;  %2593 = vmatmul.msk.bf16.gmra.mxu1 %vm620_vm2, %v2899_v26 }
  0x91   : > { %v1178_v51 = vsel %vm3203_vm6, %v1173_v39, %v1177_v29  ;;  %v1785_v42 = vor.u32 %v1784_v40, %v1781_v37  ;;  %v1790_v47 = vrot.slane %v1788_v41, 5  ;;  %v1432_v52 = vrot.slane %v2688_v58, 5  ;;  %v3577_v38 = vld [vmem:[%s3179_s26 + $0x38] sm:$0x1] }
  0x92   : > { %v1183_v54 = vrot.slane %v1182_v43, 4  ;;  %v1306_v55 = vunpack.c.l.b16 %v1178_v51  ;;  %v1794_v50 = vrot.slane %v1792_v44, 4  ;;  %v1800_v56 = vrot.slane %v1798_v46, 5  ;;  %v2718_v51 = vld [vmem:[%s3179_s26 + $0x24] sm:$0xe] }
  0x93   : > { %v1786_v45 = vrot.slane %v1785_v42, 4  ;;  %v1433_v59 = vsel %vm3181_vm3, %v2727_v48, %v1432_v52  ;;  %v1434_v60 = vrot.slane %v1432_v52, 4  ;;  %v1435_v61 = vrot.slane %v3512_v62, 5 }
  0x94   : > { %v1188_v53 = vsel %vm3203_vm6, %v1183_v54, %v1187_v36  ;;  %v1795_v63 = vor.u32 %v1794_v50, %v1790_v47  ;;  %v1486_v2 = vunpack.c.l.b16 %v1433_v59  ;;  %v1642_v58 = vsel %vm620_vm2, %v2920_v49, 0 }
  0x95   : > { %v1307_v4 = vunpack.c.l.b16 %v1188_v53  ;;  %v1791_v7 = vsel %vm3203_vm6, %v1786_v45, %v1790_v47  ;;  %v1436_v9 = vsel %vm3181_vm3, %v1434_v60, %v1435_v61  ;;  %1664 = vmatpush.bf16.xpose.msrb.mxu2 %v1642_v58  ;;  %v1142_v62 = vshrl.u32 %v2684_v57, 16 }
  0x96   : > { %v1796_v12 = vrot.slane %v1795_v63, 4  ;;  %v1919_v13 = vunpack.c.l.b16 %v1791_v7  ;;  %v1487_v15 = vunpack.c.l.b16 %v1436_v9  ;;  %v1145_v16 = vshll.u32 %v2684_v57, 16  ;;  %v2681_v63 = vld [vmem:[%s3179_s26 + $0x18] sm:$0xf] }
  0x97   : > { %v1319_v17 = vpack.c.b16 %v1307_v4, %v1306_v55  ;;  %v1144_v22 = vrot.slane %v1142_v62, 4  ;;  %v1151_v23 = vshll.u32 %v3554_v3, 16  ;;  %v1155_v24 = vshrl.u32 %v3554_v3, 16  ;;  %v2919_v55 = vld [vmem:[%s3179_s26 + $0x24] sm:$0xff] }
  0x98   : > { %v1801_v27 = vsel %vm3203_vm6, %v1796_v12, %v1800_v56  ;;  %v1499_v28 = vpack.c.b16 %v1487_v15, %v1486_v2  ;;  %v1147_v29 = vrot.slane %v1145_v16, 5  ;;  %v1161_v31 = vshll.u32 %v3561_v10, 16  ;;  %v3596_v15 = vld [vmem:[%s3179_s26 + $0x1c] sm:$0xf] }
  0x99   : > { %v1340_v33 = vsel %vm620_vm2, %v1319_v17, 0  ;;  %v1920_v35 = vunpack.c.l.b16 %v1801_v27  ;;  %v1153_v36 = vrot.slane %v1151_v23, 5  ;;  %v1157_v37 = vrot.slane %v1155_v24, 4 }
  0x9a   : > { %1358 = vmatpush.bf16.xpose.msrb.mxu0 %v1340_v33  ;;  %v1520_v39 = vsel %vm620_vm2, %v1499_v28, 0  ;;  %v1148_v40 = vor.u32 %v1147_v29, %v1144_v22  ;;  %v1163_v41 = vrot.slane %v1161_v31, 5  ;;  %v1755_v43 = vshrl.u32 %v2814_v21, 16  ;;  %v2683_v28 = vld [vmem:[%s3179_s26 + $0x20] sm:$0x1] }
  0x9b   : > { %v1932_v44 = vpack.c.b16 %v1920_v35, %v1919_v13  ;;  %1538 = vmatpush.bf16.xpose.msrb.mxu1 %v1520_v39  ;;  %v1158_v46 = vor.u32 %v1157_v37, %v1153_v36  ;;  %v1758_v48 = vshll.u32 %v2814_v21, 16  ;;  %v1764_v49 = vshll.u32 %v3573_v32, 16  ;;  %v2811_v33 = vld [vmem:[%s3179_s26 + $0x24] sm:$0xf] }
  0x9c   : > { %v1149_v42 = vrot.slane %v1148_v40, 4  ;;  %v1757_v47 = vrot.slane %v1755_v43, 4  ;;  %v1768_v52 = vshrl.u32 %v3573_v32, 16  ;;  %v1774_v54 = vshll.u32 %v3577_v38, 16  ;;  %v3611_v40 = vld [vmem:[%s3179_s26 + $0x28] sm:$0xf] }
  0x9d   : > { %v1953_v50 = vsel %vm620_vm2, %v1932_v44, 0  ;;  %v1159_v56 = vrot.slane %v1158_v46, 4  ;;  %v1760_v57 = vrot.slane %v1758_v48, 5  ;;  %v1766_v45 = vrot.slane %v1764_v49, 5 }
  0x9e   : > { %1971 = vmatpush.bf16.xpose.msrb.mxu3 %v1953_v50  ;;  %v1154_v59 = vsel %vm3203_vm6, %v1149_v42, %v1153_v36  ;;  %v1770_v60 = vrot.slane %v1768_v52, 4  ;;  %v1776_v61 = vrot.slane %v1774_v54, 5  ;;  %v2726_v53 = vrot.slane %v2718_v51, 9 }
  0x9f   : > { %v1164_v2 = vsel %vm3203_vm6, %v1159_v56, %v1163_v41  ;;  %v1304_v58 = vunpack.c.l.b16 %v1154_v59  ;;  %v1761_v4 = vor.u32 %v1760_v57, %v1757_v47  ;;  %v1425_v7 = vrot.slane %v3554_v3, 5  ;;  %v2717_v56 = vld [vmem:[%s3179_s26 + $0x18] sm:$0xe] }
  0xa0   : > { %v1305_v9 = vunpack.c.l.b16 %v1164_v2  ;;  %v1771_v62 = vor.u32 %v1770_v60, %v1766_v45  ;;  %v1428_v12 = vrot.slane %v3561_v10, 5  ;;  %v1639_v13 = vsel %vm620_vm2, %v2919_v55, 0  ;;  %v3615_v55 = vld [vmem:[%s3179_s26 + $0x2c] sm:$0x1] }
  0xa1   : > { %v1762_v16 = vrot.slane %v1761_v4, 4  ;;  %v1426_v17 = vsel %vm3181_vm3, %v2726_v53, %v1425_v7  ;;  %v1427_v22 = vrot.slane %v1425_v7, 4  ;;  %1665 = vmatpush.bf16.xpose.msrb.mxu2 %v1639_v13  ;;  %v1118_v23 = vshrl.u32 %v2681_v63, 16 }
  0xa2   : > { %v1318_v24 = vpack.c.b16 %v1305_v9, %v1304_v58  ;;  %v1772_v3 = vrot.slane %v1771_v62, 4  ;;  %v1484_v21 = vunpack.c.l.b16 %v1426_v17  ;;  %v1121_v26 = vshll.u32 %v2681_v63, 16  ;;  %v2918_v58 = vld [vmem:[%s3179_s26 + $0x18] sm:$0xff] }
  0xa3   : > { %v1767_v10 = vsel %vm3203_vm6, %v1762_v16, %v1766_v45  ;;  %v1429_v27 = vsel %vm3181_vm3, %v1427_v22, %v1428_v12  ;;  %v1120_v29 = vrot.slane %v1118_v23, 4  ;;  %v1127_v31 = vshll.u32 %v3596_v15, 16 }
  0xa4   : > { %v1337_v35 = vsel %vm620_vm2, %v1318_v24, 0  ;;  %v1777_v36 = vsel %vm3203_vm6, %v1772_v3, %v1776_v61  ;;  %v1917_v37 = vunpack.c.l.b16 %v1767_v10  ;;  %v1485_v39 = vunpack.c.l.b16 %v1429_v27 }
  0xa5   : > { %1359 = vmatpush.bf16.xpose.msrb.mxu0 %v1337_v35  ;;  %v1918_v41 = vunpack.c.l.b16 %v1777_v36  ;;  %v1123_v43 = vrot.slane %v1121_v26, 5  ;;  %v1129_v44 = vrot.slane %v1127_v31, 5  ;;  %v1131_v46 = vshrl.u32 %v3596_v15, 16  ;;  %v2678_v31 = vld [vmem:[%s3179_s26 + $0xc] sm:$0xf] }
  0xa6   : > { %v1498_v48 = vpack.c.b16 %v1485_v39, %v1484_v21  ;;  %v1137_v49 = vshll.u32 %v2683_v28, 16  ;;  %v1731_v51 = vshrl.u32 %v2811_v33, 16  ;;  %v1734_v42 = vshll.u32 %v2811_v33, 16  ;;  %v2853_v21 = vld [vmem:[%s3179_s26 + $0x6c] sm:$0xe] }
  0xa7   : > { %v1931_v47 = vpack.c.b16 %v1918_v41, %v1917_v37  ;;  %v1124_v52 = vor.u32 %v1123_v43, %v1120_v29  ;;  %v1133_v54 = vrot.slane %v1131_v46, 4  ;;  %v1740_v50 = vshll.u32 %v3611_v40, 16  ;;  %v3637_v36 = vld [vmem:[%s3179_s26 + $0x10] sm:$0xf] }
  0xa8   : > { %v1517_v57 = vsel %vm620_vm2, %v1498_v48, 0  ;;  %v1139_v45 = vrot.slane %v1137_v49, 5  ;;  %v1733_v59 = vrot.slane %v1731_v51, 4  ;;  %v1736_v60 = vrot.slane %v1734_v42, 5 }
  0xa9   : > { %v1950_v61 = vsel %vm620_vm2, %v1931_v47, 0  ;;  %1539 = vmatpush.bf16.xpose.msrb.mxu1 %v1517_v57  ;;  %v1125_v53 = vrot.slane %v1124_v52, 4  ;;  %v1134_v63 = vor.u32 %v1133_v54, %v1129_v44  ;;  %v1742_v2 = vrot.slane %v1740_v50, 5  ;;  %v2926_v54 = vld [vmem:[%s3869_s1 + $0x60] sm:$0xff] }
  0xaa   : > { %1972 = vmatpush.bf16.xpose.msrb.mxu3 %v1950_v61  ;;  %v1737_v4 = vor.u32 %v1736_v60, %v1733_v59  ;;  %v1744_v7 = vshrl.u32 %v3611_v40, 16  ;;  %v1750_v9 = vshll.u32 %v3615_v55, 16  ;;  %v2725_v62 = vrot.slane %v2717_v56, 9  ;;  %v2808_v59 = vld [vmem:[%s3179_s26 + $0x18] sm:$0xf] }
  0xab   : > { %v1130_v12 = vsel %vm3203_vm6, %v1125_v53, %v1129_v44  ;;  %v1135_v13 = vrot.slane %v1134_v63, 4  ;;  %v1418_v16 = vrot.slane %v3596_v15, 5  ;;  %v1421_v17 = vrot.slane %v2683_v28, 5 }
  0xac   : > { %v1302_v22 = vunpack.c.l.b16 %v1130_v12  ;;  %v1738_v23 = vrot.slane %v1737_v4, 4  ;;  %v1746_v24 = vrot.slane %v1744_v7, 4  ;;  %v1752_v3 = vrot.slane %v1750_v9, 5 }
  0xad   : > { %v1140_v26 = vsel %vm3203_vm6, %v1135_v13, %v1139_v45  ;;  %v1419_v10 = vsel %vm3181_vm3, %v2725_v62, %v1418_v16  ;;  %v1420_v27 = vrot.slane %v1418_v16, 4  ;;  %v1636_v29 = vsel %vm620_vm2, %v2918_v58, 0  ;;  %v2680_v45 = vld [vmem:[%s3179_s26 + $0x14] sm:$0x1]  ;;  %v3663_v16 = vld [vmem:[%s3179_s26 + $0x20] sm:$0x1] }
  0xae   : > { %v1303_v33 = vunpack.c.l.b16 %v1140_v26  ;;  %v1743_v15 = vsel %vm3203_vm6, %v1738_v23, %v1742_v2  ;;  %v1747_v28 = vor.u32 %v1746_v24, %v1742_v2  ;;  %v1482_v35 = vunpack.c.l.b16 %v1419_v10  ;;  %1666 = vmatpush.bf16.xpose.msrb.mxu2 %v1636_v29  ;;  %v3658_v2 = vld [vmem:[%s3179_s26 + $0x1c] sm:$0xf]  ;;  %v2716_v24 = vld [vmem:[%s3179_s26 + $0xc] sm:$0xe] }
  0xaf   : > { %v1915_v37 = vunpack.c.l.b16 %v1743_v15  ;;  %v1422_v39 = vsel %vm3181_vm3, %v1420_v27, %v1421_v17  ;;  %v2861_v41 = vrot.slane %v2853_v21, 9  ;;  %v2073_v43 = vrot.slane %v3344_v5, 5  ;;  %v2852_v15 = vld [vmem:[%s3179_s26 + $0x60] sm:$0xe] }
  0xb0   : > { %v1317_v44 = vpack.c.b16 %v1303_v33, %v1302_v22  ;;  %v1748_v46 = vrot.slane %v1747_v28, 4  ;;  %v1483_v48 = vunpack.c.l.b16 %v1422_v39  ;;  %v1094_v49 = vshrl.u32 %v2678_v31, 16 }
  0xb1   : > { %v2074_v51 = vsel %vm3181_vm3, %v2861_v41, %v2073_v43  ;;  %v2075_v42 = vrot.slane %v2073_v43, 4  ;;  %v1097_v47 = vshll.u32 %v2678_v31, 16  ;;  %v1103_v52 = vshll.u32 %v3637_v36, 16 }
  0xb2   : > { %v1334_v50 = vsel %vm620_vm2, %v1317_v44, 0  ;;  %v1753_v5 = vsel %vm3203_vm6, %v1748_v46, %v1752_v3  ;;  %v1497_v56 = vpack.c.b16 %v1483_v48, %v1482_v35  ;;  %v2107_v57 = vunpack.c.l.b16 %v2074_v51 }
  0xb3   : > { %1360 = vmatpush.bf16.xpose.msrb.mxu0 %v1334_v50  ;;  %v1916_v60 = vunpack.c.l.b16 %v1753_v5  ;;  %v2077_v61 = vsel %vm3181_vm3, %v2075_v42, %v2076_v20  ;;  %v1096_v53 = vrot.slane %v1094_v49, 4  ;;  %v1099_v63 = vrot.slane %v1097_v47, 5  ;;  %v2851_v47 = vld [vmem:[%s3179_s26 + $0x54] sm:$0xe] }
  0xb4   : > { %v1514_v58 = vsel %vm620_vm2, %v1497_v56, 0  ;;  %v2108_v4 = vunpack.c.l.b16 %v2077_v61  ;;  %v1105_v7 = vrot.slane %v1103_v52, 5  ;;  %v1107_v9 = vshrl.u32 %v3637_v36, 16 }
  0xb5   : > { %v1930_v62 = vpack.c.b16 %v1916_v60, %v1915_v37  ;;  %1540 = vmatpush.bf16.xpose.msrb.mxu1 %v1514_v58  ;;  %v1100_v12 = vor.u32 %v1099_v63, %v1096_v53  ;;  %v1113_v13 = vshll.u32 %v2680_v45, 16  ;;  %v1707_v6 = vshrl.u32 %v2808_v59, 16  ;;  %2806 = vmatmul.msk.bf16.vlgmr.msrb.gmra.mxu2 %vm620_vm2, %v2926_v54 }
  0xb6   : > { %v2116_v20 = vpack.c.b16 %v2108_v4, %v2107_v57  ;;  %v1109_v17 = vrot.slane %v1107_v9, 4  ;;  %v1710_v22 = vshll.u32 %v2808_v59, 16  ;;  %v1716_v23 = vshll.u32 %v3658_v2, 16 }
  0xb7   : > { %v1947_v3 = vsel %vm620_vm2, %v1930_v62, 0  ;;  %v1101_v21 = vrot.slane %v1100_v12, 4  ;;  %v1115_v26 = vrot.slane %v1113_v13, 5  ;;  %v1709_v10 = vrot.slane %v1707_v6, 4 }
  0xb8   : > { %1973 = vmatpush.bf16.xpose.msrb.mxu3 %v1947_v3  ;;  %v2145_v27 = vsel %vm620_vm2, %v2116_v20, 0  ;;  %v1110_v29 = vor.u32 %v1109_v17, %v1105_v7  ;;  %v1712_v31 = vrot.slane %v1710_v22, 5  ;;  %v1718_v33 = vrot.slane %v1716_v23, 5  ;;  %v2927_v17 = vld [vmem:[%s3869_s1 + $0x68] sm:$0xff]  ;;  %v2849_v3 = vld [vmem:[%s3179_s26 + $0x3c] sm:$0xe] }
  0xb9   : > { %2944 = vmatpush.bf16.xpose.msra.mxu2 %v2145_v27  ;;  %v1106_v28 = vsel %vm3203_vm6, %v1101_v21, %v1105_v7  ;;  %v1720_v35 = vshrl.u32 %v3658_v2, 16  ;;  %v1726_v37 = vshll.u32 %v3663_v16, 16  ;;  %v2724_v39 = vrot.slane %v2716_v24, 9  ;;  %v2850_v22 = vld [vmem:[%s3179_s26 + $0x48] sm:$0xe] }
  0xba   : > { %v1111_v41 = vrot.slane %v1110_v29, 4  ;;  %v1300_v43 = vunpack.c.l.b16 %v1106_v28  ;;  %v1713_v44 = vor.u32 %v1712_v31, %v1709_v10  ;;  %v1411_v46 = vrot.slane %v3637_v36, 5  ;;  %v2914_v28 = vld [vmem:[%s3869_s1 + $0x40] sm:$0xff] }
  0xbb   : > { %v1722_v48 = vrot.slane %v1720_v35, 4  ;;  %v1728_v49 = vrot.slane %v1726_v37, 5  ;;  %v1414_v51 = vrot.slane %v2680_v45, 5  ;;  %v2860_v42 = vrot.slane %v2852_v15, 9 }
  0xbc   : > { %v1116_v52 = vsel %vm3203_vm6, %v1111_v41, %v1115_v26  ;;  %v1714_v54 = vrot.slane %v1713_v44, 4  ;;  %v1412_v50 = vsel %vm3181_vm3, %v2724_v39, %v1411_v46  ;;  %v1413_v5 = vrot.slane %v1411_v46, 4  ;;  %v2848_v46 = vld [vmem:[%s3179_s26 + $0x30] sm:$0xe] }
  0xbd   : > { %v1301_v56 = vunpack.c.l.b16 %v1116_v52  ;;  %v1723_v57 = vor.u32 %v1722_v48, %v1718_v33  ;;  %v1480_v59 = vunpack.c.l.b16 %v1412_v50  ;;  %v2066_v60 = vrot.slane %v3388_v1, 5  ;;  %v2916_v48 = vld [vmem:[%s3869_s1 + $0x50] sm:$0xff] }
  0xbe   : > { %v1719_v36 = vsel %vm3203_vm6, %v1714_v54, %v1718_v33  ;;  %v1415_v45 = vsel %vm3181_vm3, %v1413_v5, %v1414_v51  ;;  %v2069_v61 = vrot.slane %v3391_v11, 5  ;;  %v2859_v53 = vrot.slane %v2851_v47, 9  ;;  %v2928_v50 = vld [vmem:[%s3869_s1 + $0x70] sm:$0xff] }
  0xbf   : > { %v1316_v63 = vpack.c.b16 %v1301_v56, %v1300_v43  ;;  %v1724_v58 = vrot.slane %v1723_v57, 4  ;;  %v1913_v4 = vunpack.c.l.b16 %v1719_v36  ;;  %v1481_v7 = vunpack.c.l.b16 %v1415_v45 }
  0xc0   : > { %v2067_v9 = vsel %vm3181_vm3, %v2860_v42, %v2066_v60  ;;  %v2068_v62 = vrot.slane %v2066_v60, 4  ;;  %v2059_v1 = vrot.slane %v3437_v8, 5  ;;  %v2062_v12 = vrot.slane %v3443_v18, 5 }
  0xc1   : > { %v1331_v13 = vsel %vm620_vm2, %v1316_v63, 0  ;;  %v1729_v6 = vsel %vm3203_vm6, %v1724_v58, %v1728_v49  ;;  %v1496_v11 = vpack.c.b16 %v1481_v7, %v1480_v59  ;;  %v2105_v20 = vunpack.c.l.b16 %v2067_v9  ;;  %v2200_v7 = vld [vmem:[%s3871_s3 + $0x10] sm:$0xff] }
  0xc2   : > { %1361 = vmatpush.bf16.xpose.msrb.mxu0 %v1331_v13  ;;  %v1914_v23 = vunpack.c.l.b16 %v1729_v6  ;;  %v2070_v24 = vsel %vm3181_vm3, %v2068_v62, %v2069_v61  ;;  %v2060_v8 = vsel %vm3181_vm3, %v2859_v53, %v2059_v1  ;;  %v2061_v18 = vrot.slane %v2059_v1, 4  ;;  %v2917_v13 = vld [vmem:[%s3869_s1 + $0x58] sm:$0xff]  ;;  %v2198_v6 = vld [vmem:[%s3871_s3] sm:$0xff] }
  0xc3   : > { %v1511_v34 = vsel %vm620_vm2, %v1496_v11, 0  ;;  %v2106_v21 = vunpack.c.l.b16 %v2070_v24  ;;  %v2103_v26 = vunpack.c.l.b16 %v2060_v8  ;;  %v2858_v31 = vrot.slane %v2850_v22, 9  ;;  %v2201_v11 = vld [vmem:[%s3871_s3 + $0x18] sm:$0xff]  ;;  %v2847_v22 = vld [vmem:[%s3179_s26 + $0x24] sm:$0xe] }
  0xc4   : > { %v1929_v10 = vpack.c.b16 %v1914_v23, %v1913_v4  ;;  %1541 = vmatpush.bf16.xpose.msrb.mxu1 %v1511_v34  ;;  %v2063_v29 = vsel %vm3181_vm3, %v2061_v18, %v2062_v12  ;;  %v2052_v33 = vrot.slane %v3483_v14, 5  ;;  %v2045_v37 = vrot.slane %v3529_v25, 5  ;;  %v2172_v25 = vld [vmem:[%s3870_s2 + $0x10] sm:$0xff]  ;;  %v2173_v4 = vld [vmem:[%s3870_s2 + $0x18] sm:$0xff]  ;;  %v2915_v12 = vld [vmem:[%s3869_s1 + $0x48] sm:$0xff] }
  0xc5   : > { %v2115_v15 = vpack.c.b16 %v2106_v21, %v2105_v20  ;;  %v2104_v35 = vunpack.c.l.b16 %v2063_v29  ;;  %2807 = vmatmul.msk.bf16.gmra.mxu2 %vm620_vm2, %v2927_v17  ;;  %v2055_v43 = vrot.slane %v3487_v19, 5  ;;  %v2048_v44 = vrot.slane %v3533_v30, 5  ;;  %v2929_v20 = vld [vmem:[%s3869_s1 + $0x78] sm:$0xff] }
  0xc6   : > { %v1944_v39 = vsel %vm620_vm2, %v1929_v10, 0  ;;  %v2054_v41 = vrot.slane %v2052_v33, 4  ;;  %v2053_v19 = vsel %vm3181_vm3, %v2858_v31, %v2052_v33  ;;  %v2047_v30 = vrot.slane %v2045_v37, 4  ;;  %v2241_v18 = vld [vmem:[%s3775_s23 + $0x18] sm:$0xff] }
  0xc7   : > { %1974 = vmatpush.bf16.xpose.msrb.mxu3 %v1944_v39  ;;  %v2142_v14 = vsel %vm620_vm2, %v2115_v15, 0  ;;  %v2114_v51 = vpack.c.b16 %v2104_v35, %v2103_v26  ;;  %v3069_v47 = vmov 0   ;;  %v2856_v52 = vrot.slane %v2848_v46, 9  ;;  %v2846_v10 = vld [vmem:[%s3179_s26 + $0x18] sm:$0xe]  ;;  %v2238_v15 = vld [vmem:[%s3775_s23] sm:$0xff] }
  0xc8   : > { %2945 = vmatpush.bf16.xpose.msra.mxu2 %v2142_v14  ;;  %3010 = vset.pattern.permute.xlu0 %v3069_v47  ;;  %v2038_v54 = vrot.slane %v3573_v32, 5  ;;  %v2056_v5 = vsel %vm3181_vm3, %v2054_v41, %v2055_v43  ;;  %v2049_v56 = vsel %vm3181_vm3, %v2047_v30, %v2048_v44  ;;  %v2041_v57 = vrot.slane %v3577_v38, 5  ;;  %v2930_v30 = vld [vmem:[%s3869_s1 + $0x80] sm:$0xff]  ;;  %s2883_s26 = sshll.u32 (%p3161_p5), %s3055_s30, 3 }
  0xc9   : > { %2714 = vmatmul.msk.bf16.vlgmr.msrb.gmra.mxu0 %vm620_vm2, %v2914_v28  ;;  %2186 = vperm.xlu0 %3010, %v2172_v25   ;;  %v2100_v59 = vunpack.c.l.b16 %v2049_v56  ;;  %v2101_v36 = vunpack.c.l.b16 %v2053_v19  ;;  %v2139_v61 = vsel %vm620_vm2, %v2114_v51, 0  ;;  %v2102_v53 = vunpack.c.l.b16 %v2056_v5  ;;  %v2239_v25 = vld [vmem:[%s3775_s23 + $0x8] sm:$0xff]  ;;  %s2319_s22 = sadd.s32 (%p3161_p5), %s3051_s29, %s2883_s26 }
  0xca   : > { %2147 = vmatpush.bf16.xpose.msra.mxu0 %v2145_v27  ;;  %v2857_v27 = vrot.slane %v2849_v3, 9  ;;  %3011 = vset.pattern.permute.xlu1 %v3069_v47  ;;  %v2039_v32 = vsel %vm3181_vm3, %v2856_v52, %v2038_v54  ;;  %v2040_v60 = vrot.slane %v2038_v54, 4  ;;  %v2031_v17 = vrot.slane %v3611_v40, 5  ;;  %v2199_v3 = vld [vmem:[%s3871_s3 + $0x8] sm:$0xff]  ;;  %s2884_s19 = sshll.u32 (%p3161_p5), %s2319_s22, 2 }
  0xcb   : > { %2744 = vmatmul.msk.bf16.vlgmr.msrb.gmra.mxu1 %vm620_vm2, %v2916_v48  ;;  %v2097_v45 = vunpack.c.l.b16 %v2039_v32  ;;  %3012 = vset.pattern.permute.xlu2 %v3069_v47  ;;  %v2113_v62 = vpack.c.b16 %v2102_v53, %v2101_v36  ;;  %v2855_v24 = vrot.slane %v2847_v22, 9  ;;  %v2034_v40 = vrot.slane %v3615_v55, 5  ;;  %v2170_v55 = vld [vmem:[%s3870_s2] sm:$0xff]  ;;  %v2240_v48 = vld [vmem:[%s3775_s23 + $0x10] sm:$0xff]  ;;  %v2931_v19 = vld [vmem:[%s3869_s1 + $0x88] sm:$0xff]  ;;  %s334_s23 = sand.u32 1, %s3043_s27   ;;  %s2321_s14 = scalar_lea.vmem (%p3161_p5), %s3875_s7, %s2884_s19 }
  0xcc   : > { %v2046_v49 = vsel %vm3181_vm3, %v2857_v27, %v2045_v37  ;;  %v2042_v38 = vsel %vm3181_vm3, %v2040_v60, %v2041_v57  ;;  %2214 = vperm.xlu1 %3011, %v2200_v7   ;;  %v2033_v8 = vrot.slane %v2031_v17, 4  ;;  %v2024_v26 = vrot.slane %v3658_v2, 5  ;;  %2176 = vperm.xlu2 %3012, %v2170_v55   ;;  %v2270_v2 = vld [vmem:[%s3874_s6] sm:$0xff]  ;;  %v2171_v37 = vld [vmem:[%s3870_s2 + $0x8] sm:$0xff]  ;;  %s2532_s15 = sshll.u32 %s334_s23, 4 }
  0xcd   : > { %v2099_v42 = vunpack.c.l.b16 %v2046_v49  ;;  %v2098_v58 = vunpack.c.l.b16 %v2042_v38  ;;  %v2136_v1 = vsel %vm620_vm2, %v2113_v62, 0  ;;  %v2032_v34 = vsel %vm3181_vm3, %v2855_v24, %v2031_v17  ;;  %s3822_s17 = scalar_lea.vmem [#allocation2], %s2532_s15  ;;  %s342_s21 = scalar_lea.vmem [#allocation3], %s2532_s15 }
  0xce   : > { %2844 = vmatmul.msk.bf16.vlgmr.msrb.gmra.mxu3 %vm620_vm2, %v2928_v50  ;;  %v2035_v21 = vsel %vm3181_vm3, %v2033_v8, %v2034_v40  ;;  %v2095_v31 = vunpack.c.l.b16 %v2032_v34  ;;  %v2854_v28 = vrot.slane %v2846_v10, 9  ;;  %v2026_v35 = vrot.slane %v2024_v26, 4 }
  0xcf   : > { %v2112_v63 = vpack.c.b16 %v2100_v59, %v2099_v42  ;;  %v2111_v9 = vpack.c.b16 %v2098_v58, %v2097_v45  ;;  %v2096_v33 = vunpack.c.l.b16 %v2035_v21  ;;  %v2027_v27 = vrot.slane %v3663_v16, 5 }
  0xd0   : > { %2946 = vmatpush.bf16.xpose.msra.mxu2 %v2139_v61  ;;  %v2025_v41 = vsel %vm3181_vm3, %v2854_v28, %v2024_v26 }
  0xd1   : > { %2191 = vperm.xlu0 %3010, %v2173_v4   ;;  %v2133_v23 = vsel %vm620_vm2, %v2112_v63, 0  ;;  %v2130_v29 = vsel %vm620_vm2, %v2111_v9, 0  ;;  %v2110_v39 = vpack.c.b16 %v2096_v33, %v2095_v31  ;;  %v2028_v43 = vsel %vm3181_vm3, %v2026_v35, %v2027_v27 }
  0xd2   : > { %2148 = vmatpush.bf16.xpose.msra.mxu0 %v2142_v14  ;;  %v2093_v44 = vunpack.c.l.b16 %v2025_v41  ;;  %v2094_v46 = vunpack.c.l.b16 %v2028_v43  ;;  %v2271_v14 = vld [vmem:[%s3874_s6 + $0x8] sm:$0xff] }
  0xd3   : > { %v2127_v16 = vsel %vm620_vm2, %v2110_v39, 0 }
  0xd4   : > { %2219 = vperm.xlu1 %3011, %v2201_v11   ;;  %2181 = vperm.xlu2 %3012, %v2171_v37   ;;  %v2109_v49 = vpack.c.b16 %v2094_v46, %v2093_v44 }
  0xd6   : > { %v2124_v0 = vsel %vm620_vm2, %v2109_v49, 0 }
  0xd8   : > { %2947 = vmatpush.bf16.xpose.msra.mxu2 %v2136_v1 }
  0xd9   : > { %2715 = vmatmul.msk.bf16.gmra.mxu0 %vm620_vm2, %v2915_v12  ;;  %2204 = vperm.xlu0 %3010, %v2198_v6  }
  0xda   : > { %2149 = vmatpush.bf16.xpose.msra.mxu0 %v2139_v61 }
  0xdb   : > { %2745 = vmatmul.msk.bf16.gmra.mxu1 %vm620_vm2, %v2917_v13 }
  0xdc   : > { %2209 = vperm.xlu1 %3011, %v2199_v3   ;;  %2254 = vperm.xlu2 %3012, %v2240_v48  }
  0xde   : > { %2845 = vmatmul.msk.bf16.gmra.mxu3 %vm620_vm2, %v2929_v20 }
  0xe0   : > { %2948 = vmatpush.bf16.xpose.msra.mxu2 %v2133_v23 }
  0xe1   : > { %2259 = vperm.xlu0 %3010, %v2241_v18  }
  0xe2   : > { %2150 = vmatpush.bf16.xpose.msra.mxu0 %v2136_v1 }
  0xe4   : > { %2244 = vperm.xlu1 %3011, %v2238_v15   ;;  %2249 = vperm.xlu2 %3012, %v2239_v25  }
  0xe5   : > { %v660_v51 = vpop.f32.mrf.mxu0 }
  0xe8   : > { %2949 = vmatpush.bf16.xpose.msra.mxu2 %v2130_v29  ;;  %v759_v47 = vpop.f32.mrf.mxu1 }
  0xe9   : > { %2274 = vperm.xlu0 %3010, %v2270_v2   ;;  %v930_v42 = vpop.f32.mrf.mxu2  ;;  %v760_v9 = vadd.f32 %v759_v47, %v660_v51 }
  0xea   : > { %2151 = vmatpush.bf16.xpose.msra.mxu0 %v2133_v23 }
  0xeb   : > { %v940_v13 = vadd.f32 %v930_v42, %v760_v9 }
  0xec   : > { %2279 = vperm.xlu1 %3011, %v2271_v14   ;;  %v1055_v50 = vpop.f32.mrf.mxu3 }
  0xed   : > { %v662_v52 = vpop.f32.mrf.mxu0  ;;  %v1065_v20 = vadd.f32 %v1055_v50, %v940_v13 }
  0xf0   : > { %2950 = vmatpush.bf16.xpose.msra.mxu2 %v2127_v16  ;;  %v761_v5 = vpop.f32.mrf.mxu1 }
  0xf1   : > { %v932_v54 = vpop.f32.mrf.mxu2  ;;  %v762_v17 = vadd.f32 %v761_v5, %v662_v52 }
  0xf2   : > { %2152 = vmatpush.bf16.xpose.msra.mxu0 %v2130_v29 }
  0xf3   : > { %v941_v40 = vadd.f32 %v932_v54, %v762_v17 }
  0xf4   : > { %v1057_v59 = vpop.f32.mrf.mxu3 }
  0xf5   : > { %v1066_v31 = vadd.f32 %v1057_v59, %v941_v40 }
  0xf8   : > { %2951 = vmatpush.bf16.xpose.msra.mxu2 %v2124_v0 }
  0xfa   : > { %2153 = vmatpush.bf16.xpose.msra.mxu0 %v2127_v16 }
  0xff   : > { %2875 = vmatmul.msk.bf16.vlgmr.msra.gmra.mxu2 %vm620_vm2, %v2931_v19 }
 0x100   : > { %v665_v56 = vpop.f32.mrf.mxu0 }
 0x102   : > { %2154 = vmatpush.bf16.xpose.msra.mxu0 %v2124_v0 }
 0x105   : > { %v935_v57 = vpop.f32.mrf.mxu2 }
 0x108   : > { %v667_v60 = vpop.f32.mrf.mxu0  ;;  %v1060_v45 = vpop.f32.mrf.mxu3 }
 0x109   : > { %2874 = vmatmul.msk.bf16.vlgmr.msra.gmra.mxu0 %vm620_vm2, %v2930_v30 }
 0x10d   : > { %v764_v32 = vpop.f32.mrf.mxu1  ;;  %v937_v36 = vpop.f32.mrf.mxu2 }
 0x10e   : > { %v765_v1 = vadd.f32 %v764_v32, %v665_v56 }
 0x110   : > { %v1062_v38 = vpop.f32.mrf.mxu3  ;;  %v942_v6 = vadd.f32 %v935_v57, %v765_v1 }
 0x112   : > { %v1067_v23 = vadd.f32 %v1060_v45, %v942_v6 }
 0x115   : > { %v766_v61 = vpop.f32.mrf.mxu1 }
 0x116   : > { %v767_v8 = vadd.f32 %v766_v61, %v667_v60 }
 0x118   : > { %v943_v55 = vadd.f32 %v937_v36, %v767_v8 }
 0x11a   : > { %v1068_v27 = vadd.f32 %v1062_v38, %v943_v55 }
 0x126   : > { %v2177_v26 = vpop.permute.xlu2 %2176 }
 0x12e   : > { %v2182_v48 = vpop.permute.xlu2 %2181 }
 0x136   : > { %v2255_v60 = vpop.permute.xlu2 %2254 }
 0x138   : > { %v1668_v63 = vpop.f32.mrf.mxu2 }
 0x13b   : > { %v2187_v34 = vpop.permute.xlu0 %2186 }
 0x13e   : > { %v2215_v29 = vpop.permute.xlu1 %2214 }
 0x140   : > { %v1670_v7 = vpop.f32.mrf.mxu2 }
 0x143   : > { %v2192_v44 = vpop.permute.xlu0 %2191 }
 0x146   : > { %v1363_v53 = vpop.f32.mrf.mxu0  ;;  %v2220_v25 = vpop.permute.xlu1 %2219 }
 0x147   : > { %v1373_v18 = vadd.f32 %v1363_v53, %v1065_v20 }
 0x148   : > { %v1543_v58 = vpop.f32.mrf.mxu1  ;;  %v1673_v22 = vpop.f32.mrf.mxu2 }
 0x149   : > { %v1553_v33 = vadd.f32 %v1543_v58, %v1373_v18 }
 0x14b   : > { %v1678_v2 = vadd.f32 %v1668_v63, %v1553_v33  ;;  %v2205_v57 = vpop.permute.xlu0 %2204 }
 0x14e   : > { %v1365_v4 = vpop.f32.mrf.mxu0  ;;  %v2210_v53 = vpop.permute.xlu1 %2209 }
 0x14f   : > { %v1374_v28 = vadd.f32 %v1365_v4, %v1066_v31 }
 0x150   : > { %v1545_v12 = vpop.f32.mrf.mxu1  ;;  %v1675_v35 = vpop.f32.mrf.mxu2 }
 0x151   : > { %v1976_v62 = vpop.f32.mrf.mxu3  ;;  %v1554_v43 = vadd.f32 %v1545_v12, %v1374_v28 }
 0x152   : > { %v1986_v14 = vadd.f32 %v1976_v62, %v1678_v2 }
 0x153   : > { %v1679_v19 = vadd.f32 %v1670_v7, %v1554_v43  ;;  %v2260_v6 = vpop.permute.xlu0 %2259 }
 0x156   : > { %v1368_v11 = vpop.f32.mrf.mxu0  ;;  %v2245_v8 = vpop.permute.xlu1 %2244 }
 0x157   : > { %v1375_v21 = vadd.f32 %v1368_v11, %v1067_v23 }
 0x158   : > { %v1548_v3 = vpop.f32.mrf.mxu1 }
 0x159   : > { %v1978_v24 = vpop.f32.mrf.mxu3  ;;  %v1555_v15 = vadd.f32 %v1548_v3, %v1375_v21  ;;  %v2932_v3 = vld [vmem:[%s3873_s5] sm:$0xff] }
 0x15a   : > { %v1987_v52 = vadd.f32 %v1978_v24, %v1679_v19 }
 0x15b   : > { %v1680_v39 = vadd.f32 %v1673_v22, %v1555_v15  ;;  %v2250_v22 = vpop.permute.xlu2 %2249 }
 0x15e   : > { %v1370_v10 = vpop.f32.mrf.mxu0  ;;  %v2280_v55 = vpop.permute.xlu1 %2279 }
 0x15f   : > { %v1376_v41 = vadd.f32 %v1370_v10, %v1068_v27 }
 0x160   : > { %v1550_v16 = vpop.f32.mrf.mxu1 }
 0x161   : > { %v1981_v37 = vpop.f32.mrf.mxu3  ;;  %v1556_v0 = vadd.f32 %v1550_v16, %v1376_v41 }
 0x162   : > { %v1988_v49 = vadd.f32 %v1981_v37, %v1680_v39 }
 0x163   : > { %v1681_v47 = vadd.f32 %v1675_v35, %v1556_v0 }
 0x169   : > { %v1983_v54 = vpop.f32.mrf.mxu3 }
 0x16a   : > { %v1989_v32 = vadd.f32 %v1983_v54, %v1681_v47 }
 0x182   : > { %v2161_v51 = vpop.f32.mrf.mxu2 }
 0x183   : > { %v2168_v42 = vadd.f32 %v2161_v51, %v1988_v49 }
 0x185   : > { %v2196_v5 = vmul.f32 %v2187_v34, %v2168_v42  ;;  %v2275_v34 = vpop.permute.xlu0 %2274 }
 0x186   : > { %v2156_v46 = vpop.f32.mrf.mxu0 }
 0x187   : > { %v2166_v30 = vadd.f32 %v2156_v46, %v1986_v14  ;;  %v2224_v63 = vadd.f32 %v2215_v29, %v2196_v5 }
 0x189   : > { %v2194_v50 = vmul.f32 %v2177_v26, %v2166_v30  ;;  %v2228_v62 = vmax.f32 %v2224_v63, 0.0 }
 0x18a   : > { %v2163_v61 = vpop.f32.mrf.mxu2 }
 0x18b   : > { %v2222_v36 = vadd.f32 %v2205_v57, %v2194_v50  ;;  %v2169_v38 = vadd.f32 %v2163_v61, %v1989_v32  ;;  %v2264_v11 = vmul.f32 %v2255_v60, %v2228_v62 }
 0x18d   : > { %v2197_v4 = vmul.f32 %v2192_v44, %v2169_v38  ;;  %v2226_v7 = vmax.f32 %v2222_v36, 0.0 }
 0x18e   : > { %v2158_v56 = vpop.f32.mrf.mxu0 }
 0x18f   : > { %v2167_v59 = vadd.f32 %v2158_v56, %v1987_v52  ;;  %v2225_v1 = vadd.f32 %v2220_v25, %v2197_v4  ;;  %v2262_v40 = vmul.f32 %v2245_v8, %v2226_v7 }
 0x191   : > { %v2195_v45 = vmul.f32 %v2182_v48, %v2167_v59  ;;  %v2229_v13 = vmax.f32 %v2225_v1, 0.0 }
 0x193   : > { %v2223_v58 = vadd.f32 %v2210_v53, %v2195_v45  ;;  %v2941_v20 = vpack.c.bf16 %v2229_v13, %v2228_v62  ;;  %v2265_v17 = vmul.f32 %v2260_v6, %v2229_v13 }
 0x195   : > { %v2227_v9 = vmax.f32 %v2223_v58, 0.0  ;;  %v2267_v23 = vpack.c.bf16 %v2265_v17, %v2264_v11  ;;  %2943 = vst [vmem:[%s3822_s17 + $0x8] sm:$0xff] %v2941_v20  }
 0x197   : > { %v2936_v12 = vpack.c.bf16 %v2227_v9, %v2226_v7  ;;  %v2263_v24 = vmul.f32 %v2250_v22, %v2227_v9  ;;  %2297 = vmatpush.bf16.msra.mxu1 %v2267_v23 }
 0x199   : > { %2937 = vst [vmem:[%s3822_s17] sm:$0xff] %v2936_v12   ;;  %v2266_v18 = vpack.c.bf16 %v2263_v24, %v2262_v40 }
 0x19b   : > { %2298 = vmatpush.bf16.msra.mxu1 %v2266_v18 }
 0x19c   : > { %v2342_v15 = vld [vmem:[%s3822_s17 + $0x8] sm:$0xf] (%p3161_p5)  ;;  %v2344_v28 = vld [vmem:[%s3822_s17 + $0xc] sm:$0xf] (%p3161_p5) }
 0x19d   : > { %2343 = vst [vmem:[%s2321_s14 + $0x10] sm:$0xf] (%p3161_p5), %v2342_v15 }
 0x19e   : > { %2880 = vmatmul.msk.bf16.vlgmr.msra.gmra.mxu1 %vm2287_vm7, %v2932_v3  ;;  %2345 = vst [vmem:[%s2321_s14 + $0x18] sm:$0xf] (%p3161_p5), %v2344_v28 }
 0x1a0   : > { %v2338_v31 = vld [vmem:[%s3822_s17] sm:$0xf] (%p3161_p5)  ;;  %v2340_v33 = vld [vmem:[%s3822_s17 + $0x4] sm:$0xf] (%p3161_p5) }
 0x1a1   : > { %2339 = vst [vmem:[%s2321_s14] sm:$0xf] (%p3161_p5), %v2338_v31 }
 0x1a2   : > { %2341 = vst [vmem:[%s2321_s14 + $0x8] sm:$0xf] (%p3161_p5), %v2340_v33 }
 0x21b   : > { %v2300_v21 = vpop.f32.mrf.mxu1 }
 0x21c   : > { %v2301_v26 = vadd.f32 %v2300_v21, %v2275_v34 }
 0x21e   : > { %2305 = vst [vmem:[%s342_s21] sm:$0xff] %v2301_v26 }
 0x222   : > { %2317 = sbr.rel (!%p3161_p5) target bundleno = 551 (0x227), region = 52 }
 0x223   : > { %v2302_v10 = vpop.f32.mrf.mxu1 }
 0x224   : > { %v2303_v29 = vadd.f32 %v2302_v10, %v2280_v55 }
 0x226   : > { %2306 = vst [vmem:[%s342_s21 + $0x8] sm:$0xff] %v2303_v29 }
 0x227 PF: > { %2377 = sbr.rel (!%p3161_p5) target bundleno = 559 (0x22f), region = 93  ;;  %s2885_s23 = sshll.u32 (%p3161_p5), %s3055_s30, 2  ;;  %v2412_v35 = vld [vmem:[%s342_s21] sm:$0xff] (%p3161_p5) }
 0x228   : > { %s2379_s15 = sadd.s32 (%p3161_p5), %s3051_s29, %s2885_s23 }
 0x229   : > { %s2886_s27 = sshll.u32 (%p3161_p5), %s2379_s15, 3 }
 0x22a   : > { %s2381_s22 = scalar_lea.vmem (%p3161_p5), %s3876_s8, %s2886_s27 }
 0x22b   : > { %2413 = vst [vmem:[%s2381_s22] sm:$0xff] (%p3161_p5), %v2412_v35 }
 0x22d   : > { %v2414_v27 = vld [vmem:[%s342_s21 + $0x8] sm:$0xff] }
 0x22e   : > { %2415 = vst [vmem:[%s2381_s22 + $0x10] sm:$0xff] %v2414_v27 }
 0x22f PF: > { %s19_s11 = sadd.s32 1, %s3067_s11   ;;  %s3882_s27 = smov %s3047_s28 }
 0x230   : > { %p16_p11 = scmp.ge.s32.totalorder %s19_s11, 6   ;;  %s3883_s28 = smov %s3172_s20 }
 0x231   : > { %s3884_s29 = smov %s3059_s9  ;;  %s3885_s30 = smov %s3063_s10 }
 0x232   : > { %s3886_s9 = smov %s3889_s12  ;;  %s3887_s10 = smov %s3893_s13 }
 0x233   :  { %18 = sbr.rel (!%p16_p11) target bundleno = 4 (0x4), region = 182 }

</bundles_post_ra>
